<compile_context>
chip_gen: v7x
topology: tpu7x:2x2x1
jax: 0.10.0
libtpu: 0.0.40
codegen_flags: <defaults>
</compile_context>

<pallas_src>
import jax
import jax.numpy as jnp
import numpy as np
from jax.experimental import pallas as pl
from jax.experimental.pallas import tpu as pltpu


# ------------------------------ Pallas kernel ------------------------------

def sim_kernel(x_ref,            # (T*Bp, E)  embedded tokens, time-major, flattened
               w_ih_ref,         # (E, 4H)    LSTM input weights (pre-transposed)
               w_hh_ref,         # (H, 4H)    LSTM hidden weights (pre-transposed)
               b_lstm_ref,       # (1, 4H)    b_ih + b_hh
               w1_ref, b1_ref,   # (H, H), (1, H)      enc.Linear0
               w2_ref, b2_ref,   # (H, H), (1, H)      enc.Linear1
               w3_ref, b3_ref,   # (H, P), (1, P)      out_img.Linear  (P = img*img)
               o_ref,            # (Bp, P)  output image logits
               h_out_ref):       # (Bp, H)  enc output
    TB, _E = x_ref.shape
    Bp = h_out_ref.shape[0]
    H = w_hh_ref.shape[0]
    T = TB // Bp

    # Hoisted input projection + bias: one big MXU matmul, one broadcast.
    x_proj = (jnp.dot(x_ref[...], w_ih_ref[...],
                      preferred_element_type=jnp.float32)
              + b_lstm_ref[...])                                 # (T*Bp, 4H)

    w_hh = w_hh_ref[...]                                         # keep in regs

    # Recurrence: h/c stay vreg-resident; fully unrolled (T is static).
    h = jnp.zeros((Bp, H), jnp.float32)
    c = jnp.zeros((Bp, H), jnp.float32)
    for t in range(T):
        gates = (x_proj[t * Bp:(t + 1) * Bp, :]                  # static, aligned slice
                 + jnp.dot(h, w_hh, preferred_element_type=jnp.float32))
        # PyTorch LSTM gate order: i, f, g, o -- slices at 128-lane boundaries
        i = jax.nn.sigmoid(gates[:, 0:H])
        f = jax.nn.sigmoid(gates[:, H:2 * H])
        g = jnp.tanh(gates[:, 2 * H:3 * H])
        o = jax.nn.sigmoid(gates[:, 3 * H:4 * H])
        c = f * c + i * g
        h = o * jnp.tanh(c)

    # enc: Linear -> ReLU -> Linear
    e1 = jnp.maximum(
        jnp.dot(h, w1_ref[...], preferred_element_type=jnp.float32)
        + b1_ref[...], 0.0)
    h_enc = (jnp.dot(e1, w2_ref[...], preferred_element_type=jnp.float32)
             + b2_ref[...])
    h_out_ref[...] = h_enc.astype(h_out_ref.dtype)

    # out_img: ReLU -> Linear
    o_img = (jnp.dot(jnp.maximum(h_enc, 0.0), w3_ref[...],
                     preferred_element_type=jnp.float32)
             + b3_ref[...])
    o_ref[...] = o_img.astype(o_ref.dtype)


# ------------------------------ wrapper -------------------------------------

def _full_spec(shape):
    n = len(shape)
    return pl.BlockSpec(shape, lambda i, _n=n: (0,) * _n)


def sim_forward(inp, params):
    """inp: int32 (B, T) token ids.  Returns (o, h) like the PyTorch module."""
    emb_table = params["emb"]                        # (V, E)
    x = emb_table[inp]                               # (B, T, E) gather (glue)

    B, T, E = x.shape
    H = params["w_hh"].shape[0]
    P = params["w3"].shape[1]

    # Pad batch to a full sublane tile (8) -> full vregs, unmasked stores.
    Bp = max(8, ((B + 7) // 8) * 8)
    if Bp != B:
        x = jnp.pad(x, ((0, Bp - B), (0, 0), (0, 0)))
    x = jnp.transpose(x, (1, 0, 2)).reshape(T * Bp, E)   # time-major, flattened

    kernel_args = (
        x,
        params["w_ih"], params["w_hh"], params["b_lstm"],
        params["w1"], params["b1"],
        params["w2"], params["b2"],
        params["w3"], params["b3"],
    )

    o_pad, h_pad = pl.pallas_call(
        sim_kernel,
        out_shape=(
            jax.ShapeDtypeStruct((Bp, P), jnp.float32),
            jax.ShapeDtypeStruct((Bp, H), jnp.float32),
        ),
        grid=(1,),
        in_specs=[_full_spec(a.shape) for a in kernel_args],
        out_specs=(
            _full_spec((Bp, P)),
            _full_spec((Bp, H)),
        ),
        compiler_params=pltpu.CompilerParams(
            dimension_semantics=("arbitrary",)),
    )(*kernel_args)

    return o_pad[:B], h_pad[:B]  # (o, h)


# ------------------------------ reference (pure JAX) ------------------------

def sim_reference(inp, params):
    x = params["emb"][inp]                                        # (B, T, E)
    B, T, _ = x.shape
    H = params["w_hh"].shape[0]
    h = jnp.zeros((B, H), jnp.float32)
    c = jnp.zeros((B, H), jnp.float32)
    for t in range(T):
        gates = x[:, t, :] @ params["w_ih"] + h @ params["w_hh"] + params["b_lstm"]
        i = jax.nn.sigmoid(gates[:, 0:H])
        f = jax.nn.sigmoid(gates[:, H:2 * H])
        g = jnp.tanh(gates[:, 2 * H:3 * H])
        o = jax.nn.sigmoid(gates[:, 3 * H:4 * H])
        c = f * c + i * g
        h = o * jnp.tanh(c)
    e1 = jnp.maximum(h @ params["w1"] + params["b1"], 0.0)
    h_enc = e1 @ params["w2"] + params["b2"]
    o_img = jnp.maximum(h_enc, 0.0) @ params["w3"] + params["b3"]
    return o_img, h_enc


# ------------------------------ param init ----------------------------------

def init_params(key, vocab_size, emb_size, hidden_size, img_size):
    P = img_size * img_size
    keys = jax.random.split(key, 12)
    u = lambda k, shape, s=0.1: jax.random.uniform(k, shape, jnp.float32, -s, s)
    return {
        "emb":    u(keys[0], (vocab_size, emb_size)),
        # LSTM weights, pre-transposed to (in, out); gate order i,f,g,o
        "w_ih":   u(keys[1], (emb_size, 4 * hidden_size)),
        "w_hh":   u(keys[2], (hidden_size, 4 * hidden_size)),
        "b_lstm": u(keys[3], (1, 4 * hidden_size)),   # = b_ih + b_hh folded
        # enc
        "w1": u(keys[4], (hidden_size, hidden_size)),
        "b1": u(keys[5], (1, hidden_size)),
        "w2": u(keys[6], (hidden_size, hidden_size)),
        "b2": u(keys[7], (1, hidden_size)),
        # out_img
        "w3": u(keys[8], (hidden_size, P)),
        "b3": u(keys[9], (1, P)),
    }


# ------------------------------ main -----------------------------------------

if __name__ == "__main__":
    # small shapes consistent with the module
    batch, seq = 2, 8
    vocab_size, emb_size, hidden_size, img_size = 10, 128, 128, 16

    key = jax.random.PRNGKey(0)
    kp, ki = jax.random.split(key)
    params = init_params(kp, vocab_size, emb_size, hidden_size, img_size)
    inp = jax.random.randint(ki, (batch, seq), 0, vocab_size, dtype=jnp.int32)

    o, h = sim_forward(inp, params)
    o = jax.block_until_ready(o)
    h = jax.block_until_ready(h)

    o_ref, h_ref = sim_reference(inp, params)
    np.testing.assert_allclose(np.asarray(o), np.asarray(o_ref), rtol=1e-3, atol=1e-4)
    np.testing.assert_allclose(np.asarray(h), np.asarray(h_ref), rtol=1e-3, atol=1e-4)

    assert o.shape == (batch, img_size * img_size)
    assert h.shape == (batch, hidden_size)
    print("KERNEL_OK")
</pallas_src>

<mosaic_0001>
module attributes {stable_mosaic.version = 11 : i64} {
  func.func @sim_kernel(%arg0: i32, %arg1: memref<64x128xf32, #tpu.memory_space<vmem>>, %arg2: memref<128x512xf32, #tpu.memory_space<vmem>>, %arg3: memref<128x512xf32, #tpu.memory_space<vmem>>, %arg4: memref<1x512xf32, #tpu.memory_space<vmem>>, %arg5: memref<128x128xf32, #tpu.memory_space<vmem>>, %arg6: memref<1x128xf32, #tpu.memory_space<vmem>>, %arg7: memref<128x128xf32, #tpu.memory_space<vmem>>, %arg8: memref<1x128xf32, #tpu.memory_space<vmem>>, %arg9: memref<128x256xf32, #tpu.memory_space<vmem>>, %arg10: memref<1x256xf32, #tpu.memory_space<vmem>>, %arg11: memref<8x256xf32, #tpu.memory_space<vmem>>, %arg12: memref<8x128xf32, #tpu.memory_space<vmem>>) attributes {dimension_semantics = [#tpu.dimension_semantics<arbitrary>], iteration_bounds = array<i64: 1>, scalar_prefetch = 0 : i64, scratch_operands = 0 : i64, tpu.core_type = #tpu.core_type<tc>, window_params = [{pipeline_mode = #tpu.pipeline_mode<synchronous>, transform_indices = @transform_0, window_bounds = array<i64: 64, 128>}, {pipeline_mode = #tpu.pipeline_mode<synchronous>, transform_indices = @transform_1, window_bounds = array<i64: 128, 512>}, {pipeline_mode = #tpu.pipeline_mode<synchronous>, transform_indices = @transform_2, window_bounds = array<i64: 128, 512>}, {pipeline_mode = #tpu.pipeline_mode<synchronous>, transform_indices = @transform_3, window_bounds = array<i64: 1, 512>}, {pipeline_mode = #tpu.pipeline_mode<synchronous>, transform_indices = @transform_4, window_bounds = array<i64: 128, 128>}, {pipeline_mode = #tpu.pipeline_mode<synchronous>, transform_indices = @transform_5, window_bounds = array<i64: 1, 128>}, {pipeline_mode = #tpu.pipeline_mode<synchronous>, transform_indices = @transform_6, window_bounds = array<i64: 128, 128>}, {pipeline_mode = #tpu.pipeline_mode<synchronous>, transform_indices = @transform_7, window_bounds = array<i64: 1, 128>}, {pipeline_mode = #tpu.pipeline_mode<synchronous>, transform_indices = @transform_8, window_bounds = array<i64: 128, 256>}, {pipeline_mode = #tpu.pipeline_mode<synchronous>, transform_indices = @transform_9, window_bounds = array<i64: 1, 256>}, {pipeline_mode = #tpu.pipeline_mode<synchronous>, transform_indices = @transform_10, window_bounds = array<i64: 8, 256>}, {pipeline_mode = #tpu.pipeline_mode<synchronous>, transform_indices = @transform_11, window_bounds = array<i64: 8, 128>}]} {
    %c0 = arith.constant 0 : index
    %c0_0 = arith.constant 0 : index
    %0 = vector.load %arg1[%c0, %c0_0] : memref<64x128xf32, #tpu.memory_space<vmem>>, vector<64x128xf32>
    %c0_1 = arith.constant 0 : index
    %c0_2 = arith.constant 0 : index
    %1 = vector.load %arg2[%c0_1, %c0_2] : memref<128x512xf32, #tpu.memory_space<vmem>>, vector<128x512xf32>
    %cst = arith.constant dense<0.000000e+00> : vector<64x512xf32>
    %2 = tpu.matmul %0, %1, %cst {dimension_numbers = #tpu.dot_dimension_numbers<[1], [0], [0], [1], [0, 0, 1, 1], [], []>} : vector<64x128xf32>, vector<128x512xf32>, vector<64x512xf32> -> vector<64x512xf32>
    %c0_3 = arith.constant 0 : index
    %c0_4 = arith.constant 0 : index
    %3 = vector.load %arg4[%c0_3, %c0_4] : memref<1x512xf32, #tpu.memory_space<vmem>>, vector<1x512xf32>
    %4 = vector.broadcast %3 : vector<1x512xf32> to vector<64x512xf32>
    %5 = arith.addf %2, %4 : vector<64x512xf32>
    %c0_5 = arith.constant 0 : index
    %c0_6 = arith.constant 0 : index
    %6 = vector.load %arg3[%c0_5, %c0_6] : memref<128x512xf32, #tpu.memory_space<vmem>>, vector<128x512xf32>
    %cst_7 = arith.constant 0.000000e+00 : f32
    %7 = vector.broadcast %cst_7 : f32 to vector<8x128xf32>
    %cst_8 = arith.constant 0.000000e+00 : f32
    %8 = vector.broadcast %cst_8 : f32 to vector<8x128xf32>
    %9 = vector.extract_strided_slice %5 {offsets = [0, 0], sizes = [8, 512], strides = [1, 1]} : vector<64x512xf32> to vector<8x512xf32>
    %cst_9 = arith.constant dense<0.000000e+00> : vector<8x512xf32>
    %10 = tpu.matmul %7, %6, %cst_9 {dimension_numbers = #tpu.dot_dimension_numbers<[1], [0], [0], [1], [0, 0, 1, 1], [], []>} : vector<8x128xf32>, vector<128x512xf32>, vector<8x512xf32> -> vector<8x512xf32>
    %11 = arith.addf %9, %10 : vector<8x512xf32>
    %12 = vector.extract_strided_slice %11 {offsets = [0, 0], sizes = [8, 128], strides = [1, 1]} : vector<8x512xf32> to vector<8x128xf32>
    %13 = arith.negf %12 : vector<8x128xf32>
    %14 = math.exp %13 : vector<8x128xf32>
    %cst_10 = arith.constant 1.000000e+00 : f32
    %15 = vector.broadcast %cst_10 : f32 to vector<8x128xf32>
    %16 = arith.addf %15, %14 : vector<8x128xf32>
    %17 = arith.divf %15, %16 : vector<8x128xf32>
    %18 = vector.extract_strided_slice %11 {offsets = [0, 128], sizes = [8, 128], strides = [1, 1]} : vector<8x512xf32> to vector<8x128xf32>
    %19 = arith.negf %18 : vector<8x128xf32>
    %20 = math.exp %19 : vector<8x128xf32>
    %cst_11 = arith.constant 1.000000e+00 : f32
    %21 = vector.broadcast %cst_11 : f32 to vector<8x128xf32>
    %22 = arith.addf %21, %20 : vector<8x128xf32>
    %23 = arith.divf %21, %22 : vector<8x128xf32>
    %24 = vector.extract_strided_slice %11 {offsets = [0, 256], sizes = [8, 128], strides = [1, 1]} : vector<8x512xf32> to vector<8x128xf32>
    %25 = math.tanh %24 : vector<8x128xf32>
    %26 = vector.extract_strided_slice %11 {offsets = [0, 384], sizes = [8, 128], strides = [1, 1]} : vector<8x512xf32> to vector<8x128xf32>
    %27 = arith.negf %26 : vector<8x128xf32>
    %28 = math.exp %27 : vector<8x128xf32>
    %cst_12 = arith.constant 1.000000e+00 : f32
    %29 = vector.broadcast %cst_12 : f32 to vector<8x128xf32>
    %30 = arith.addf %29, %28 : vector<8x128xf32>
    %31 = arith.divf %29, %30 : vector<8x128xf32>
    %32 = arith.mulf %23, %8 : vector<8x128xf32>
    %33 = arith.mulf %17, %25 : vector<8x128xf32>
    %34 = arith.addf %32, %33 : vector<8x128xf32>
    %35 = math.tanh %34 : vector<8x128xf32>
    %36 = arith.mulf %31, %35 : vector<8x128xf32>
    %37 = vector.extract_strided_slice %5 {offsets = [8, 0], sizes = [8, 512], strides = [1, 1]} : vector<64x512xf32> to vector<8x512xf32>
    %cst_13 = arith.constant dense<0.000000e+00> : vector<8x512xf32>
    %38 = tpu.matmul %36, %6, %cst_13 {dimension_numbers = #tpu.dot_dimension_numbers<[1], [0], [0], [1], [0, 0, 1, 1], [], []>} : vector<8x128xf32>, vector<128x512xf32>, vector<8x512xf32> -> vector<8x512xf32>
    %39 = arith.addf %37, %38 : vector<8x512xf32>
    %40 = vector.extract_strided_slice %39 {offsets = [0, 0], sizes = [8, 128], strides = [1, 1]} : vector<8x512xf32> to vector<8x128xf32>
    %41 = arith.negf %40 : vector<8x128xf32>
    %42 = math.exp %41 : vector<8x128xf32>
    %cst_14 = arith.constant 1.000000e+00 : f32
    %43 = vector.broadcast %cst_14 : f32 to vector<8x128xf32>
    %44 = arith.addf %43, %42 : vector<8x128xf32>
    %45 = arith.divf %43, %44 : vector<8x128xf32>
    %46 = vector.extract_strided_slice %39 {offsets = [0, 128], sizes = [8, 128], strides = [1, 1]} : vector<8x512xf32> to vector<8x128xf32>
    %47 = arith.negf %46 : vector<8x128xf32>
    %48 = math.exp %47 : vector<8x128xf32>
    %cst_15 = arith.constant 1.000000e+00 : f32
    %49 = vector.broadcast %cst_15 : f32 to vector<8x128xf32>
    %50 = arith.addf %49, %48 : vector<8x128xf32>
    %51 = arith.divf %49, %50 : vector<8x128xf32>
    %52 = vector.extract_strided_slice %39 {offsets = [0, 256], sizes = [8, 128], strides = [1, 1]} : vector<8x512xf32> to vector<8x128xf32>
    %53 = math.tanh %52 : vector<8x128xf32>
    %54 = vector.extract_strided_slice %39 {offsets = [0, 384], sizes = [8, 128], strides = [1, 1]} : vector<8x512xf32> to vector<8x128xf32>
    %55 = arith.negf %54 : vector<8x128xf32>
    %56 = math.exp %55 : vector<8x128xf32>
    %cst_16 = arith.constant 1.000000e+00 : f32
    %57 = vector.broadcast %cst_16 : f32 to vector<8x128xf32>
    %58 = arith.addf %57, %56 : vector<8x128xf32>
    %59 = arith.divf %57, %58 : vector<8x128xf32>
    %60 = arith.mulf %51, %34 : vector<8x128xf32>
    %61 = arith.mulf %45, %53 : vector<8x128xf32>
    %62 = arith.addf %60, %61 : vector<8x128xf32>
    %63 = math.tanh %62 : vector<8x128xf32>
    %64 = arith.mulf %59, %63 : vector<8x128xf32>
    %65 = vector.extract_strided_slice %5 {offsets = [16, 0], sizes = [8, 512], strides = [1, 1]} : vector<64x512xf32> to vector<8x512xf32>
    %cst_17 = arith.constant dense<0.000000e+00> : vector<8x512xf32>
    %66 = tpu.matmul %64, %6, %cst_17 {dimension_numbers = #tpu.dot_dimension_numbers<[1], [0], [0], [1], [0, 0, 1, 1], [], []>} : vector<8x128xf32>, vector<128x512xf32>, vector<8x512xf32> -> vector<8x512xf32>
    %67 = arith.addf %65, %66 : vector<8x512xf32>
    %68 = vector.extract_strided_slice %67 {offsets = [0, 0], sizes = [8, 128], strides = [1, 1]} : vector<8x512xf32> to vector<8x128xf32>
    %69 = arith.negf %68 : vector<8x128xf32>
    %70 = math.exp %69 : vector<8x128xf32>
    %cst_18 = arith.constant 1.000000e+00 : f32
    %71 = vector.broadcast %cst_18 : f32 to vector<8x128xf32>
    %72 = arith.addf %71, %70 : vector<8x128xf32>
    %73 = arith.divf %71, %72 : vector<8x128xf32>
    %74 = vector.extract_strided_slice %67 {offsets = [0, 128], sizes = [8, 128], strides = [1, 1]} : vector<8x512xf32> to vector<8x128xf32>
    %75 = arith.negf %74 : vector<8x128xf32>
    %76 = math.exp %75 : vector<8x128xf32>
    %cst_19 = arith.constant 1.000000e+00 : f32
    %77 = vector.broadcast %cst_19 : f32 to vector<8x128xf32>
    %78 = arith.addf %77, %76 : vector<8x128xf32>
    %79 = arith.divf %77, %78 : vector<8x128xf32>
    %80 = vector.extract_strided_slice %67 {offsets = [0, 256], sizes = [8, 128], strides = [1, 1]} : vector<8x512xf32> to vector<8x128xf32>
    %81 = math.tanh %80 : vector<8x128xf32>
    %82 = vector.extract_strided_slice %67 {offsets = [0, 384], sizes = [8, 128], strides = [1, 1]} : vector<8x512xf32> to vector<8x128xf32>
    %83 = arith.negf %82 : vector<8x128xf32>
    %84 = math.exp %83 : vector<8x128xf32>
    %cst_20 = arith.constant 1.000000e+00 : f32
    %85 = vector.broadcast %cst_20 : f32 to vector<8x128xf32>
    %86 = arith.addf %85, %84 : vector<8x128xf32>
    %87 = arith.divf %85, %86 : vector<8x128xf32>
    %88 = arith.mulf %79, %62 : vector<8x128xf32>
    %89 = arith.mulf %73, %81 : vector<8x128xf32>
    %90 = arith.addf %88, %89 : vector<8x128xf32>
    %91 = math.tanh %90 : vector<8x128xf32>
    %92 = arith.mulf %87, %91 : vector<8x128xf32>
    %93 = vector.extract_strided_slice %5 {offsets = [24, 0], sizes = [8, 512], strides = [1, 1]} : vector<64x512xf32> to vector<8x512xf32>
    %cst_21 = arith.constant dense<0.000000e+00> : vector<8x512xf32>
    %94 = tpu.matmul %92, %6, %cst_21 {dimension_numbers = #tpu.dot_dimension_numbers<[1], [0], [0], [1], [0, 0, 1, 1], [], []>} : vector<8x128xf32>, vector<128x512xf32>, vector<8x512xf32> -> vector<8x512xf32>
    %95 = arith.addf %93, %94 : vector<8x512xf32>
    %96 = vector.extract_strided_slice %95 {offsets = [0, 0], sizes = [8, 128], strides = [1, 1]} : vector<8x512xf32> to vector<8x128xf32>
    %97 = arith.negf %96 : vector<8x128xf32>
    %98 = math.exp %97 : vector<8x128xf32>
    %cst_22 = arith.constant 1.000000e+00 : f32
    %99 = vector.broadcast %cst_22 : f32 to vector<8x128xf32>
    %100 = arith.addf %99, %98 : vector<8x128xf32>
    %101 = arith.divf %99, %100 : vector<8x128xf32>
    %102 = vector.extract_strided_slice %95 {offsets = [0, 128], sizes = [8, 128], strides = [1, 1]} : vector<8x512xf32> to vector<8x128xf32>
    %103 = arith.negf %102 : vector<8x128xf32>
    %104 = math.exp %103 : vector<8x128xf32>
    %cst_23 = arith.constant 1.000000e+00 : f32
    %105 = vector.broadcast %cst_23 : f32 to vector<8x128xf32>
    %106 = arith.addf %105, %104 : vector<8x128xf32>
    %107 = arith.divf %105, %106 : vector<8x128xf32>
    %108 = vector.extract_strided_slice %95 {offsets = [0, 256], sizes = [8, 128], strides = [1, 1]} : vector<8x512xf32> to vector<8x128xf32>
    %109 = math.tanh %108 : vector<8x128xf32>
    %110 = vector.extract_strided_slice %95 {offsets = [0, 384], sizes = [8, 128], strides = [1, 1]} : vector<8x512xf32> to vector<8x128xf32>
    %111 = arith.negf %110 : vector<8x128xf32>
    %112 = math.exp %111 : vector<8x128xf32>
    %cst_24 = arith.constant 1.000000e+00 : f32
    %113 = vector.broadcast %cst_24 : f32 to vector<8x128xf32>
    %114 = arith.addf %113, %112 : vector<8x128xf32>
    %115 = arith.divf %113, %114 : vector<8x128xf32>
    %116 = arith.mulf %107, %90 : vector<8x128xf32>
    %117 = arith.mulf %101, %109 : vector<8x128xf32>
    %118 = arith.addf %116, %117 : vector<8x128xf32>
    %119 = math.tanh %118 : vector<8x128xf32>
    %120 = arith.mulf %115, %119 : vector<8x128xf32>
    %121 = vector.extract_strided_slice %5 {offsets = [32, 0], sizes = [8, 512], strides = [1, 1]} : vector<64x512xf32> to vector<8x512xf32>
    %cst_25 = arith.constant dense<0.000000e+00> : vector<8x512xf32>
    %122 = tpu.matmul %120, %6, %cst_25 {dimension_numbers = #tpu.dot_dimension_numbers<[1], [0], [0], [1], [0, 0, 1, 1], [], []>} : vector<8x128xf32>, vector<128x512xf32>, vector<8x512xf32> -> vector<8x512xf32>
    %123 = arith.addf %121, %122 : vector<8x512xf32>
    %124 = vector.extract_strided_slice %123 {offsets = [0, 0], sizes = [8, 128], strides = [1, 1]} : vector<8x512xf32> to vector<8x128xf32>
    %125 = arith.negf %124 : vector<8x128xf32>
    %126 = math.exp %125 : vector<8x128xf32>
    %cst_26 = arith.constant 1.000000e+00 : f32
    %127 = vector.broadcast %cst_26 : f32 to vector<8x128xf32>
    %128 = arith.addf %127, %126 : vector<8x128xf32>
    %129 = arith.divf %127, %128 : vector<8x128xf32>
    %130 = vector.extract_strided_slice %123 {offsets = [0, 128], sizes = [8, 128], strides = [1, 1]} : vector<8x512xf32> to vector<8x128xf32>
    %131 = arith.negf %130 : vector<8x128xf32>
    %132 = math.exp %131 : vector<8x128xf32>
    %cst_27 = arith.constant 1.000000e+00 : f32
    %133 = vector.broadcast %cst_27 : f32 to vector<8x128xf32>
    %134 = arith.addf %133, %132 : vector<8x128xf32>
    %135 = arith.divf %133, %134 : vector<8x128xf32>
    %136 = vector.extract_strided_slice %123 {offsets = [0, 256], sizes = [8, 128], strides = [1, 1]} : vector<8x512xf32> to vector<8x128xf32>
    %137 = math.tanh %136 : vector<8x128xf32>
    %138 = vector.extract_strided_slice %123 {offsets = [0, 384], sizes = [8, 128], strides = [1, 1]} : vector<8x512xf32> to vector<8x128xf32>
    %139 = arith.negf %138 : vector<8x128xf32>
    %140 = math.exp %139 : vector<8x128xf32>
    %cst_28 = arith.constant 1.000000e+00 : f32
    %141 = vector.broadcast %cst_28 : f32 to vector<8x128xf32>
    %142 = arith.addf %141, %140 : vector<8x128xf32>
    %143 = arith.divf %141, %142 : vector<8x128xf32>
    %144 = arith.mulf %135, %118 : vector<8x128xf32>
    %145 = arith.mulf %129, %137 : vector<8x128xf32>
    %146 = arith.addf %144, %145 : vector<8x128xf32>
    %147 = math.tanh %146 : vector<8x128xf32>
    %148 = arith.mulf %143, %147 : vector<8x128xf32>
    %149 = vector.extract_strided_slice %5 {offsets = [40, 0], sizes = [8, 512], strides = [1, 1]} : vector<64x512xf32> to vector<8x512xf32>
    %cst_29 = arith.constant dense<0.000000e+00> : vector<8x512xf32>
    %150 = tpu.matmul %148, %6, %cst_29 {dimension_numbers = #tpu.dot_dimension_numbers<[1], [0], [0], [1], [0, 0, 1, 1], [], []>} : vector<8x128xf32>, vector<128x512xf32>, vector<8x512xf32> -> vector<8x512xf32>
    %151 = arith.addf %149, %150 : vector<8x512xf32>
    %152 = vector.extract_strided_slice %151 {offsets = [0, 0], sizes = [8, 128], strides = [1, 1]} : vector<8x512xf32> to vector<8x128xf32>
    %153 = arith.negf %152 : vector<8x128xf32>
    %154 = math.exp %153 : vector<8x128xf32>
    %cst_30 = arith.constant 1.000000e+00 : f32
    %155 = vector.broadcast %cst_30 : f32 to vector<8x128xf32>
    %156 = arith.addf %155, %154 : vector<8x128xf32>
    %157 = arith.divf %155, %156 : vector<8x128xf32>
    %158 = vector.extract_strided_slice %151 {offsets = [0, 128], sizes = [8, 128], strides = [1, 1]} : vector<8x512xf32> to vector<8x128xf32>
    %159 = arith.negf %158 : vector<8x128xf32>
    %160 = math.exp %159 : vector<8x128xf32>
    %cst_31 = arith.constant 1.000000e+00 : f32
    %161 = vector.broadcast %cst_31 : f32 to vector<8x128xf32>
    %162 = arith.addf %161, %160 : vector<8x128xf32>
    %163 = arith.divf %161, %162 : vector<8x128xf32>
    %164 = vector.extract_strided_slice %151 {offsets = [0, 256], sizes = [8, 128], strides = [1, 1]} : vector<8x512xf32> to vector<8x128xf32>
    %165 = math.tanh %164 : vector<8x128xf32>
    %166 = vector.extract_strided_slice %151 {offsets = [0, 384], sizes = [8, 128], strides = [1, 1]} : vector<8x512xf32> to vector<8x128xf32>
    %167 = arith.negf %166 : vector<8x128xf32>
    %168 = math.exp %167 : vector<8x128xf32>
    %cst_32 = arith.constant 1.000000e+00 : f32
    %169 = vector.broadcast %cst_32 : f32 to vector<8x128xf32>
    %170 = arith.addf %169, %168 : vector<8x128xf32>
    %171 = arith.divf %169, %170 : vector<8x128xf32>
    %172 = arith.mulf %163, %146 : vector<8x128xf32>
    %173 = arith.mulf %157, %165 : vector<8x128xf32>
    %174 = arith.addf %172, %173 : vector<8x128xf32>
    %175 = math.tanh %174 : vector<8x128xf32>
    %176 = arith.mulf %171, %175 : vector<8x128xf32>
    %177 = vector.extract_strided_slice %5 {offsets = [48, 0], sizes = [8, 512], strides = [1, 1]} : vector<64x512xf32> to vector<8x512xf32>
    %cst_33 = arith.constant dense<0.000000e+00> : vector<8x512xf32>
    %178 = tpu.matmul %176, %6, %cst_33 {dimension_numbers = #tpu.dot_dimension_numbers<[1], [0], [0], [1], [0, 0, 1, 1], [], []>} : vector<8x128xf32>, vector<128x512xf32>, vector<8x512xf32> -> vector<8x512xf32>
    %179 = arith.addf %177, %178 : vector<8x512xf32>
    %180 = vector.extract_strided_slice %179 {offsets = [0, 0], sizes = [8, 128], strides = [1, 1]} : vector<8x512xf32> to vector<8x128xf32>
    %181 = arith.negf %180 : vector<8x128xf32>
    %182 = math.exp %181 : vector<8x128xf32>
    %cst_34 = arith.constant 1.000000e+00 : f32
    %183 = vector.broadcast %cst_34 : f32 to vector<8x128xf32>
    %184 = arith.addf %183, %182 : vector<8x128xf32>
    %185 = arith.divf %183, %184 : vector<8x128xf32>
    %186 = vector.extract_strided_slice %179 {offsets = [0, 128], sizes = [8, 128], strides = [1, 1]} : vector<8x512xf32> to vector<8x128xf32>
    %187 = arith.negf %186 : vector<8x128xf32>
    %188 = math.exp %187 : vector<8x128xf32>
    %cst_35 = arith.constant 1.000000e+00 : f32
    %189 = vector.broadcast %cst_35 : f32 to vector<8x128xf32>
    %190 = arith.addf %189, %188 : vector<8x128xf32>
    %191 = arith.divf %189, %190 : vector<8x128xf32>
    %192 = vector.extract_strided_slice %179 {offsets = [0, 256], sizes = [8, 128], strides = [1, 1]} : vector<8x512xf32> to vector<8x128xf32>
    %193 = math.tanh %192 : vector<8x128xf32>
    %194 = vector.extract_strided_slice %179 {offsets = [0, 384], sizes = [8, 128], strides = [1, 1]} : vector<8x512xf32> to vector<8x128xf32>
    %195 = arith.negf %194 : vector<8x128xf32>
    %196 = math.exp %195 : vector<8x128xf32>
    %cst_36 = arith.constant 1.000000e+00 : f32
    %197 = vector.broadcast %cst_36 : f32 to vector<8x128xf32>
    %198 = arith.addf %197, %196 : vector<8x128xf32>
    %199 = arith.divf %197, %198 : vector<8x128xf32>
    %200 = arith.mulf %191, %174 : vector<8x128xf32>
    %201 = arith.mulf %185, %193 : vector<8x128xf32>
    %202 = arith.addf %200, %201 : vector<8x128xf32>
    %203 = math.tanh %202 : vector<8x128xf32>
    %204 = arith.mulf %199, %203 : vector<8x128xf32>
    %205 = vector.extract_strided_slice %5 {offsets = [56, 0], sizes = [8, 512], strides = [1, 1]} : vector<64x512xf32> to vector<8x512xf32>
    %cst_37 = arith.constant dense<0.000000e+00> : vector<8x512xf32>
    %206 = tpu.matmul %204, %6, %cst_37 {dimension_numbers = #tpu.dot_dimension_numbers<[1], [0], [0], [1], [0, 0, 1, 1], [], []>} : vector<8x128xf32>, vector<128x512xf32>, vector<8x512xf32> -> vector<8x512xf32>
    %207 = arith.addf %205, %206 : vector<8x512xf32>
    %208 = vector.extract_strided_slice %207 {offsets = [0, 0], sizes = [8, 128], strides = [1, 1]} : vector<8x512xf32> to vector<8x128xf32>
    %209 = arith.negf %208 : vector<8x128xf32>
    %210 = math.exp %209 : vector<8x128xf32>
    %cst_38 = arith.constant 1.000000e+00 : f32
    %211 = vector.broadcast %cst_38 : f32 to vector<8x128xf32>
    %212 = arith.addf %211, %210 : vector<8x128xf32>
    %213 = arith.divf %211, %212 : vector<8x128xf32>
    %214 = vector.extract_strided_slice %207 {offsets = [0, 128], sizes = [8, 128], strides = [1, 1]} : vector<8x512xf32> to vector<8x128xf32>
    %215 = arith.negf %214 : vector<8x128xf32>
    %216 = math.exp %215 : vector<8x128xf32>
    %cst_39 = arith.constant 1.000000e+00 : f32
    %217 = vector.broadcast %cst_39 : f32 to vector<8x128xf32>
    %218 = arith.addf %217, %216 : vector<8x128xf32>
    %219 = arith.divf %217, %218 : vector<8x128xf32>
    %220 = vector.extract_strided_slice %207 {offsets = [0, 256], sizes = [8, 128], strides = [1, 1]} : vector<8x512xf32> to vector<8x128xf32>
    %221 = math.tanh %220 : vector<8x128xf32>
    %222 = vector.extract_strided_slice %207 {offsets = [0, 384], sizes = [8, 128], strides = [1, 1]} : vector<8x512xf32> to vector<8x128xf32>
    %223 = arith.negf %222 : vector<8x128xf32>
    %224 = math.exp %223 : vector<8x128xf32>
    %cst_40 = arith.constant 1.000000e+00 : f32
    %225 = vector.broadcast %cst_40 : f32 to vector<8x128xf32>
    %226 = arith.addf %225, %224 : vector<8x128xf32>
    %227 = arith.divf %225, %226 : vector<8x128xf32>
    %228 = arith.mulf %219, %202 : vector<8x128xf32>
    %229 = arith.mulf %213, %221 : vector<8x128xf32>
    %230 = arith.addf %228, %229 : vector<8x128xf32>
    %231 = math.tanh %230 : vector<8x128xf32>
    %232 = arith.mulf %227, %231 : vector<8x128xf32>
    %c0_41 = arith.constant 0 : index
    %c0_42 = arith.constant 0 : index
    %233 = vector.load %arg5[%c0_41, %c0_42] : memref<128x128xf32, #tpu.memory_space<vmem>>, vector<128x128xf32>
    %cst_43 = arith.constant dense<0.000000e+00> : vector<8x128xf32>
    %234 = tpu.matmul %232, %233, %cst_43 {dimension_numbers = #tpu.dot_dimension_numbers<[1], [0], [0], [1], [0, 0, 1, 1], [], []>} : vector<8x128xf32>, vector<128x128xf32>, vector<8x128xf32> -> vector<8x128xf32>
    %c0_44 = arith.constant 0 : index
    %c0_45 = arith.constant 0 : index
    %235 = vector.load %arg6[%c0_44, %c0_45] : memref<1x128xf32, #tpu.memory_space<vmem>>, vector<1x128xf32>
    %236 = vector.broadcast %235 : vector<1x128xf32> to vector<8x128xf32>
    %237 = arith.addf %234, %236 : vector<8x128xf32>
    %cst_46 = arith.constant 0.000000e+00 : f32
    %238 = vector.broadcast %cst_46 : f32 to vector<8x128xf32>
    %239 = arith.maximumf %237, %238 : vector<8x128xf32>
    %c0_47 = arith.constant 0 : index
    %c0_48 = arith.constant 0 : index
    %240 = vector.load %arg7[%c0_47, %c0_48] : memref<128x128xf32, #tpu.memory_space<vmem>>, vector<128x128xf32>
    %cst_49 = arith.constant dense<0.000000e+00> : vector<8x128xf32>
    %241 = tpu.matmul %239, %240, %cst_49 {dimension_numbers = #tpu.dot_dimension_numbers<[1], [0], [0], [1], [0, 0, 1, 1], [], []>} : vector<8x128xf32>, vector<128x128xf32>, vector<8x128xf32> -> vector<8x128xf32>
    %c0_50 = arith.constant 0 : index
    %c0_51 = arith.constant 0 : index
    %242 = vector.load %arg8[%c0_50, %c0_51] : memref<1x128xf32, #tpu.memory_space<vmem>>, vector<1x128xf32>
    %243 = vector.broadcast %242 : vector<1x128xf32> to vector<8x128xf32>
    %244 = arith.addf %241, %243 : vector<8x128xf32>
    %c0_52 = arith.constant 0 : index
    %c0_53 = arith.constant 0 : index
    %245 = vector.load %arg12[%c0_52, %c0_53] : memref<8x128xf32, #tpu.memory_space<vmem>>, vector<8x128xf32>
    tpu.vector_store %arg12[%c0_52, %c0_53], %244 {strides = array<i32>} : memref<8x128xf32, #tpu.memory_space<vmem>>, vector<8x128xf32>,
    %cst_54 = arith.constant 0.000000e+00 : f32
    %246 = vector.broadcast %cst_54 : f32 to vector<8x128xf32>
    %247 = arith.maximumf %244, %246 : vector<8x128xf32>
    %c0_55 = arith.constant 0 : index
    %c0_56 = arith.constant 0 : index
    %248 = vector.load %arg9[%c0_55, %c0_56] : memref<128x256xf32, #tpu.memory_space<vmem>>, vector<128x256xf32>
    %cst_57 = arith.constant dense<0.000000e+00> : vector<8x256xf32>
    %249 = tpu.matmul %247, %248, %cst_57 {dimension_numbers = #tpu.dot_dimension_numbers<[1], [0], [0], [1], [0, 0, 1, 1], [], []>} : vector<8x128xf32>, vector<128x256xf32>, vector<8x256xf32> -> vector<8x256xf32>
    %c0_58 = arith.constant 0 : index
    %c0_59 = arith.constant 0 : index
    %250 = vector.load %arg10[%c0_58, %c0_59] : memref<1x256xf32, #tpu.memory_space<vmem>>, vector<1x256xf32>
    %251 = vector.broadcast %250 : vector<1x256xf32> to vector<8x256xf32>
    %252 = arith.addf %249, %251 : vector<8x256xf32>
    %c0_60 = arith.constant 0 : index
    %c0_61 = arith.constant 0 : index
    %253 = vector.load %arg11[%c0_60, %c0_61] : memref<8x256xf32, #tpu.memory_space<vmem>>, vector<8x256xf32>
    tpu.vector_store %arg11[%c0_60, %c0_61], %252 {strides = array<i32>} : memref<8x256xf32, #tpu.memory_space<vmem>>, vector<8x256xf32>,
    return
  }
  func.func @transform_0(%arg0: i32) -> (i32, i32) {
    %c0_i32 = arith.constant 0 : i32
    %c0_i32_0 = arith.constant 0 : i32
    %c0_i32_1 = arith.constant 0 : i32
    return %c0_i32, %c0_i32_0 : i32, i32
  }
  func.func @transform_1(%arg0: i32) -> (i32, i32) {
    %c0_i32 = arith.constant 0 : i32
    %c0_i32_0 = arith.constant 0 : i32
    %c0_i32_1 = arith.constant 0 : i32
    return %c0_i32, %c0_i32_0 : i32, i32
  }
  func.func @transform_2(%arg0: i32) -> (i32, i32) {
    %c0_i32 = arith.constant 0 : i32
    %c0_i32_0 = arith.constant 0 : i32
    %c0_i32_1 = arith.constant 0 : i32
    return %c0_i32, %c0_i32_0 : i32, i32
  }
  func.func @transform_3(%arg0: i32) -> (i32, i32) {
    %c0_i32 = arith.constant 0 : i32
    %c0_i32_0 = arith.constant 0 : i32
    %c0_i32_1 = arith.constant 0 : i32
    return %c0_i32, %c0_i32_0 : i32, i32
  }
  func.func @transform_4(%arg0: i32) -> (i32, i32) {
    %c0_i32 = arith.constant 0 : i32
    %c0_i32_0 = arith.constant 0 : i32
    %c0_i32_1 = arith.constant 0 : i32
    return %c0_i32, %c0_i32_0 : i32, i32
  }
  func.func @transform_5(%arg0: i32) -> (i32, i32) {
    %c0_i32 = arith.constant 0 : i32
    %c0_i32_0 = arith.constant 0 : i32
    %c0_i32_1 = arith.constant 0 : i32
    return %c0_i32, %c0_i32_0 : i32, i32
  }
  func.func @transform_6(%arg0: i32) -> (i32, i32) {
    %c0_i32 = arith.constant 0 : i32
    %c0_i32_0 = arith.constant 0 : i32
    %c0_i32_1 = arith.constant 0 : i32
    return %c0_i32, %c0_i32_0 : i32, i32
  }
  func.func @transform_7(%arg0: i32) -> (i32, i32) {
    %c0_i32 = arith.constant 0 : i32
    %c0_i32_0 = arith.constant 0 : i32
    %c0_i32_1 = arith.constant 0 : i32
    return %c0_i32, %c0_i32_0 : i32, i32
  }
  func.func @transform_8(%arg0: i32) -> (i32, i32) {
    %c0_i32 = arith.constant 0 : i32
    %c0_i32_0 = arith.constant 0 : i32
    %c0_i32_1 = arith.constant 0 : i32
    return %c0_i32, %c0_i32_0 : i32, i32
  }
  func.func @transform_9(%arg0: i32) -> (i32, i32) {
    %c0_i32 = arith.constant 0 : i32
    %c0_i32_0 = arith.constant 0 : i32
    %c0_i32_1 = arith.constant 0 : i32
    return %c0_i32, %c0_i32_0 : i32, i32
  }
  func.func @transform_10(%arg0: i32) -> (i32, i32) {
    %c0_i32 = arith.constant 0 : i32
    %c0_i32_0 = arith.constant 0 : i32
    %c0_i32_1 = arith.constant 0 : i32
    return %c0_i32, %c0_i32_0 : i32, i32
  }
  func.func @transform_11(%arg0: i32) -> (i32, i32) {
    %c0_i32 = arith.constant 0 : i32
    %c0_i32_0 = arith.constant 0 : i32
    %c0_i32_1 = arith.constant 0 : i32
    return %c0_i32, %c0_i32_0 : i32, i32
  }
}

</mosaic_0001>

<bundles_post_ra>
// kernel: tpu_custom_call.1
= control target key start
LH: loop header
LB: loop body
LE: loop exit
PB: predicated region body
PF: predicated region fallthrough
CT: control target
= control target key end

     0   :  { %17 = vsyncpa [#allocation3], 0  ;;  %s4041_s0 = inlined_call_operand.hbm [shape: f32[64,128], index: 0, kind: input, shape index: {}]   ;;  %s4042_s1 = inlined_call_operand.hbm [shape: f32[128,512], index: 1, kind: input, shape index: {}]   ;;  %s4043_s2 = inlined_call_operand.hbm [shape: f32[128,512], index: 2, kind: input, shape index: {}]   ;;  %s4044_s3 = inlined_call_operand.vmem [shape: f32[1,512], index: 3, kind: input, shape index: {}]   ;;  %s4045_s4 = inlined_call_operand.hbm [shape: f32[128,128], index: 4, kind: input, shape index: {}]   ;;  %s4046_s5 = inlined_call_operand.vmem [shape: f32[1,128], index: 5, kind: input, shape index: {}]   ;;  %s4047_s6 = inlined_call_operand.hbm [shape: f32[128,128], index: 6, kind: input, shape index: {}]   ;;  %s4048_s7 = inlined_call_operand.vmem [shape: f32[1,128], index: 7, kind: input, shape index: {}]   ;;  %s4049_s8 = inlined_call_operand.hbm [shape: f32[128,256], index: 8, kind: input, shape index: {}]   ;;  %s4050_s9 = inlined_call_operand.vmem [shape: f32[1,256], index: 9, kind: input, shape index: {}]   ;;  %s4051_s10 = inlined_call_operand.hbm [shape: f32[8,256], index: 10, kind: output, shape index: {0}]   ;;  %s4052_s11 = inlined_call_operand.hbm [shape: f32[8,128], index: 11, kind: output, shape index: {1}]  }
   0x1   :  { %18 = vsyncpa [#allocation6], 0 }
   0x2   :  { %19 = vsyncpa [#allocation9], 0 }
   0x3   :  { %20 = vsyncpa [#allocation12], 0 }
   0x4   :  { %21 = vsyncpa [#allocation4], 0 }
   0x5   :  { %22 = vsyncpa [#allocation15], 0  ;;  %s3386_s17 = smov [#allocation5]   ;;  %s3198_s21 = scalar_lea.hbm %s4042_s1, 8192 }
   0x6   :  { %s40_s18 = sshll.u32 %s3386_s17, 4  ;;  %p3199_p0 = scmp.ne.s32.totalorder %s4042_s1, %s3198_s21  ;;  %s41_s18 = int_to_ptr.vmem [resolvable:$true] %s40_s18 }
   0x7   :  { %p3202_p1 = scmp.lt.u32.totalorder %s3198_s21, %s4042_s1 }
   0x9   :  { %p3204_p2 = pnand %p3202_p1, %p3199_p0 }
   0xb   :  { %3207 = shalt.err (!%p3204_p2)
}
   0xc   :  { %s3208_s26 = scalar_lea.vmem %s41_s18, 8192  ;;  %p3213_p4 = scmp.lt.s32.totalorder %s41_s18, %s41_s18 }
   0xd   :  { %p3209_p3 = scmp.ne.s32.totalorder %s41_s18, %s3208_s26  ;;  %p3214_p5 = scmp.lt.s32.totalorder %s3208_s26, %s3208_s26 }
   0xf   :  { %p3215_p6 = por %p3214_p5, %p3213_p4 }
  0x11   :  { %p3216_p7 = pnand %p3215_p6, %p3209_p3 }
  0x13   :  { %3219 = shalt.err (!%p3216_p7)
}
  0x14   :  { %s3387_s27 = smov 512   ;;  %s3388_s28 = smov 32  }
  0x15   :  { %46 = dma.hbm_to_vmem [thread:$0]  %s4042_s1, 8192, %s41_s18, [#allocation6], %s3387_s27, %s3387_s27, %s3388_s28  }
  0x16   :  { %s3389_s12 = smov [#allocation8]   ;;  %s3390_s14 = smov [#allocation2]  }
  0x17   :  { %s66_s13 = sshll.u32 %s3389_s12, 4  ;;  %s28_s15 = sshll.u32 %s3390_s14, 4  ;;  %s67_s13 = int_to_ptr.vmem [resolvable:$true] %s66_s13  ;;  %s29_s15 = int_to_ptr.vmem [resolvable:$true] %s28_s15 }
  0x18   :  { %s3220_s19 = scalar_lea.hbm %s4045_s4, 2048 }
  0x19   :  { %p3221_p8 = scmp.ne.s32.totalorder %s4045_s4, %s3220_s19  ;;  %p3224_p9 = scmp.lt.u32.totalorder %s3220_s19, %s4045_s4 }
  0x1b   :  { %p3226_p10 = pnand %p3224_p9, %p3221_p8 }
  0x1d   :  { %3229 = shalt.err (!%p3226_p10)
}
  0x1e   :  { %s3230_s1 = scalar_lea.vmem %s67_s13, 2048  ;;  %p3235_p12 = scmp.lt.s32.totalorder %s67_s13, %s67_s13 }
  0x1f   :  { %p3231_p11 = scmp.ne.s32.totalorder %s67_s13, %s3230_s1  ;;  %p3236_p13 = scmp.lt.s32.totalorder %s3230_s1, %s3230_s1 }
  0x21   :  { %p3237_p0 = por %p3236_p13, %p3235_p12 }
  0x23   :  { %p3238_p1 = pnand %p3237_p0, %p3231_p11 }
  0x25   :  { %3241 = shalt.err (!%p3238_p1)
}
  0x26   :  { %s3391_s18 = smov 128   ;;  %s3392_s24 = smov 8  }
  0x27   :  { %72 = dma.hbm_to_vmem [thread:$0]  %s4045_s4, 2048, %s67_s13, [#allocation9], %s3391_s18, %s3391_s18, %s3392_s24  }
  0x28   :  { %s3242_s12 = scalar_lea.hbm %s4041_s0, 1024 }
  0x29   :  { %p3243_p2 = scmp.ne.s32.totalorder %s4041_s0, %s3242_s12  ;;  %p3246_p3 = scmp.lt.u32.totalorder %s3242_s12, %s4041_s0 }
  0x2b   :  { %p3248_p4 = pnand %p3246_p3, %p3243_p2 }
  0x2d   :  { %3251 = shalt.err (!%p3248_p4)
}
  0x2e   :  { %s3252_s20 = scalar_lea.vmem %s29_s15, 1024  ;;  %p3257_p6 = scmp.lt.s32.totalorder %s29_s15, %s29_s15 }
  0x2f   :  { %p3253_p5 = scmp.ne.s32.totalorder %s29_s15, %s3252_s20  ;;  %p3258_p7 = scmp.lt.s32.totalorder %s3252_s20, %s3252_s20 }
  0x31   :  { %p3259_p8 = por %p3258_p7, %p3257_p6 }
  0x33   :  { %p3260_p9 = pnand %p3259_p8, %p3253_p5 }
  0x35   :  { %3263 = shalt.err (!%p3260_p9)
}
  0x36   :  { %34 = dma.hbm_to_vmem [thread:$0]  %s4041_s0, 1024, %s29_s15, [#allocation3], %s3391_s18, %s3391_s18, %s3392_s24  }
  0x37   :  { %s3393_s21 = smov [#allocation7]   ;;  %s3394_s23 = smov [#allocation10]  }
  0x38   :  { %s52_s22 = sshll.u32 %s3393_s21, 4  ;;  %s80_s1 = sshll.u32 %s3394_s23, 4  ;;  %s53_s22 = int_to_ptr.vmem [resolvable:$true] %s52_s22  ;;  %s81_s1 = int_to_ptr.vmem [resolvable:$true] %s80_s1 }
  0x39   :  { %s3264_s29 = scalar_lea.hbm %s4043_s2, 8192 }
  0x3a   :  { %p3265_p10 = scmp.ne.s32.totalorder %s4043_s2, %s3264_s29  ;;  %p3268_p11 = scmp.lt.u32.totalorder %s3264_s29, %s4043_s2 }
  0x3c   :  { %p3270_p12 = pnand %p3268_p11, %p3265_p10 }
  0x3e   :  { %3273 = shalt.err (!%p3270_p12)
}
  0x3f   :  { %s3274_s0 = scalar_lea.vmem %s53_s22, 8192  ;;  %p3279_p0 = scmp.lt.s32.totalorder %s53_s22, %s53_s22 }
  0x40   :  { %p3275_p13 = scmp.ne.s32.totalorder %s53_s22, %s3274_s0  ;;  %p3280_p1 = scmp.lt.s32.totalorder %s3274_s0, %s3274_s0 }
  0x42   :  { %p3281_p2 = por %p3280_p1, %p3279_p0 }
  0x44   :  { %p3282_p3 = pnand %p3281_p2, %p3275_p13 }
  0x46   :  { %3285 = shalt.err (!%p3282_p3)
}
  0x47   :  { %58 = dma.hbm_to_vmem [thread:$0]  %s4043_s2, 8192, %s53_s22, [#allocation6], %s3387_s27, %s3387_s27, %s3388_s28  }
  0x48   :  { %s3286_s4 = scalar_lea.hbm %s4047_s6, 2048 }
  0x49   :  { %p3287_p4 = scmp.ne.s32.totalorder %s4047_s6, %s3286_s4  ;;  %p3290_p5 = scmp.lt.u32.totalorder %s3286_s4, %s4047_s6 }
  0x4b   :  { %p3292_p6 = pnand %p3290_p5, %p3287_p4 }
  0x4d   :  { %3295 = shalt.err (!%p3292_p6)
}
  0x4e   :  { %s3296_s26 = scalar_lea.vmem %s81_s1, 2048  ;;  %p3301_p8 = scmp.lt.s32.totalorder %s81_s1, %s81_s1 }
  0x4f   :  { %p3297_p7 = scmp.ne.s32.totalorder %s81_s1, %s3296_s26  ;;  %p3302_p9 = scmp.lt.s32.totalorder %s3296_s26, %s3296_s26 }
  0x51   :  { %p3303_p10 = por %p3302_p9, %p3301_p8 }
  0x53   :  { %p3304_p11 = pnand %p3303_p10, %p3297_p7 }
  0x55   :  { %3307 = shalt.err (!%p3304_p11)
}
  0x56   :  { %86 = dma.hbm_to_vmem [thread:$0]  %s4047_s6, 2048, %s81_s1, [#allocation9], %s3391_s18, %s3391_s18, %s3392_s24  }
  0x57   :  { %s3395_s28 = smov [#allocation11]   ;;  %s3308_s12 = scalar_lea.hbm %s4049_s8, 4096 }
  0x58   :  { %s94_s22 = sshll.u32 %s3395_s28, 4  ;;  %p3309_p12 = scmp.ne.s32.totalorder %s4049_s8, %s3308_s12  ;;  %s95_s22 = int_to_ptr.vmem [resolvable:$true] %s94_s22 }
  0x59   :  { %p3312_p13 = scmp.lt.u32.totalorder %s3308_s12, %s4049_s8 }
  0x5b   :  { %p3314_p0 = pnand %p3312_p13, %p3309_p12 }
  0x5d   :  { %3317 = shalt.err (!%p3314_p0)
}
  0x5e   :  { %s3318_s17 = scalar_lea.vmem %s95_s22, 4096  ;;  %p3323_p2 = scmp.lt.s32.totalorder %s95_s22, %s95_s22 }
  0x5f   :  { %p3319_p1 = scmp.ne.s32.totalorder %s95_s22, %s3318_s17  ;;  %p3324_p3 = scmp.lt.s32.totalorder %s3318_s17, %s3318_s17 }
  0x61   :  { %p3325_p4 = por %p3324_p3, %p3323_p2 }
  0x63   :  { %p3326_p5 = pnand %p3325_p4, %p3319_p1 }
  0x65   :  { %3329 = shalt.err (!%p3326_p5)
}
  0x66   :  { %s3396_s6 = smov 256   ;;  %s3397_s18 = smov 16  }
  0x67   :  { %100 = dma.hbm_to_vmem [thread:$0]  %s4049_s8, 4096, %s95_s22, [#allocation12], %s3396_s6, %s3396_s6, %s3397_s18  }
  0x68   :  { %3374 = dma.done.wait [#allocation3], 1024  }
  0x69   :  { %3375 = vsyncadd [#allocation3], 4294966272 }
  0x6a   :  { %3376 = dma.done.wait [#allocation6], 16384  }
  0x6b   :  { %3377 = vsyncadd [#allocation6], 4294950912 }
  0x6c   :  { %3378 = dma.done.wait [#allocation9], 4096  }
  0x6d   :  { %3379 = vsyncadd [#allocation9], 4294963200 }
  0x6e   :  { %3380 = dma.done.wait [#allocation12], 4096  }
  0x6f   :  { %3381 = vsyncadd [#allocation12], 4294963200  ;;  %v3398_v0 = vmov 0.0   ;;  %v130_v1 = vld [vmem:[#allocation5 + $0x8] sm:$0xff]  ;;  %v132_v3 = vld [vmem:[#allocation5 + $0x18] sm:$0xff]  ;;  %vm3400_vm0 = vmmov 0  }
  0x70   :  { %279 = vmatprep.mubr.f32.mxu0 %v3398_v0  ;;  %392 = vmatprep.mubr.f32.mxu1 %v3398_v0  ;;  %v134_v2 = vld [vmem:[#allocation5 + $0x28] sm:$0xff]  ;;  %v136_v5 = vld [vmem:[#allocation5 + $0x38] sm:$0xff]  ;;  %v129_v6 = vld [vmem:[#allocation5] sm:$0xff] }
  0x71   :  { %v2333_v4 = vpack.c.bf16 %v134_v2, %v130_v1  ;;  %v133_v7 = vld [vmem:[#allocation5 + $0x20] sm:$0xff]  ;;  %v2365_v8 = vpack.c.bf16 %v136_v5, %v132_v3  ;;  %v131_v10 = vld [vmem:[#allocation5 + $0x10] sm:$0xff]  ;;  %v138_v12 = vld [vmem:[#allocation5 + $0x48] sm:$0xff] }
  0x72   :  { %v2335_v9 = vpack.c.bf16 %v133_v7, %v129_v6  ;;  %v135_v11 = vld [vmem:[#allocation5 + $0x30] sm:$0xff]  ;;  %v142_v14 = vld [vmem:[#allocation5 + $0x68] sm:$0xff]  ;;  %v140_v15 = vld [vmem:[#allocation5 + $0x58] sm:$0xff] }
  0x73   :  { %2334 = vmatprep.subr.bf16.mxu0 %v2333_v4  ;;  %v2367_v13 = vpack.c.bf16 %v135_v11, %v131_v10  ;;  %v144_v16 = vld [vmem:[#allocation5 + $0x78] sm:$0xff]  ;;  %2366 = vmatprep.subr.bf16.mxu1 %v2365_v8  ;;  %v2337_v17 = vpack.c.bf16 %v142_v14, %v138_v12  ;;  %v137_v19 = vld [vmem:[#allocation5 + $0x40] sm:$0xff]  ;;  %v139_v21 = vld [vmem:[#allocation5 + $0x50] sm:$0xff] }
  0x74   :  { %2336 = vmatpush1.bf16.msra.mxu0 %v2335_v9  ;;  %v2369_v18 = vpack.c.bf16 %v144_v16, %v140_v15  ;;  %v141_v20 = vld [vmem:[#allocation5 + $0x60] sm:$0xff]  ;;  %v143_v23 = vld [vmem:[#allocation5 + $0x70] sm:$0xff]  ;;  %v146_v24 = vld [vmem:[#allocation5 + $0x88] sm:$0xff] }
  0x75   :  { %2368 = vmatpush1.bf16.msra.mxu1 %v2367_v13  ;;  %v2339_v22 = vpack.c.bf16 %v141_v20, %v137_v19  ;;  %v150_v25 = vld [vmem:[#allocation5 + $0xa8] sm:$0xff]  ;;  %2338 = vmatprep.subr.bf16.mxu0 %v2337_v17  ;;  %v2371_v26 = vpack.c.bf16 %v143_v23, %v139_v21  ;;  %v148_v28 = vld [vmem:[#allocation5 + $0x98] sm:$0xff]  ;;  %v145_v30 = vld [vmem:[#allocation5 + $0x80] sm:$0xff] }
  0x76   :  { %2370 = vmatprep.subr.bf16.mxu1 %v2369_v18  ;;  %v2341_v27 = vpack.c.bf16 %v150_v25, %v146_v24  ;;  %v152_v29 = vld [vmem:[#allocation5 + $0xb8] sm:$0xff]  ;;  %v149_v32 = vld [vmem:[#allocation5 + $0xa0] sm:$0xff]  ;;  %v147_v33 = vld [vmem:[#allocation5 + $0x90] sm:$0xff] }
  0x77   :  { %v2373_v31 = vpack.c.bf16 %v152_v29, %v148_v28  ;;  %v151_v34 = vld [vmem:[#allocation5 + $0xb0] sm:$0xff]  ;;  %v2343_v35 = vpack.c.bf16 %v149_v32, %v145_v30  ;;  %v154_v36 = vld [vmem:[#allocation5 + $0xc8] sm:$0xff]  ;;  %v156_v38 = vld [vmem:[#allocation5 + $0xd8] sm:$0xff] }
  0x78   :  { %2340 = vmatpush1.bf16.msra.mxu0 %v2339_v22  ;;  %v158_v37 = vld [vmem:[#allocation5 + $0xe8] sm:$0xff]  ;;  %v2375_v39 = vpack.c.bf16 %v151_v34, %v147_v33  ;;  %v160_v41 = vld [vmem:[#allocation5 + $0xf8] sm:$0xff]  ;;  %v153_v42 = vld [vmem:[#allocation5 + $0xc0] sm:$0xff] }
  0x79   :  { %2372 = vmatpush1.bf16.msra.mxu1 %v2371_v26  ;;  %2342 = vmatprep.subr.bf16.mxu0 %v2341_v27  ;;  %v2345_v40 = vpack.c.bf16 %v158_v37, %v154_v36  ;;  %v157_v43 = vld [vmem:[#allocation5 + $0xe0] sm:$0xff]  ;;  %v2377_v44 = vpack.c.bf16 %v160_v41, %v156_v38  ;;  %v155_v45 = vld [vmem:[#allocation5 + $0xd0] sm:$0xff]  ;;  %v162_v47 = vld [vmem:[#allocation5 + $0x108] sm:$0xff] }
  0x7a   :  { %2374 = vmatprep.subr.bf16.mxu1 %v2373_v31  ;;  %v159_v46 = vld [vmem:[#allocation5 + $0xf0] sm:$0xff]  ;;  %v166_v48 = vld [vmem:[#allocation5 + $0x128] sm:$0xff]  ;;  %v164_v49 = vld [vmem:[#allocation5 + $0x118] sm:$0xff]  ;;  %v2347_v51 = vpack.c.bf16 %v157_v43, %v153_v42 }
  0x7b   :  { %v168_v50 = vld [vmem:[#allocation5 + $0x138] sm:$0xff]  ;;  %v2379_v52 = vpack.c.bf16 %v159_v46, %v155_v45  ;;  %v2349_v53 = vpack.c.bf16 %v166_v48, %v162_v47  ;;  %v161_v54 = vld [vmem:[#allocation5 + $0x100] sm:$0xff]  ;;  %v163_v56 = vld [vmem:[#allocation5 + $0x110] sm:$0xff] }
  0x7c   :  { %2344 = vmatpush1.bf16.msra.mxu0 %v2343_v35  ;;  %v165_v55 = vld [vmem:[#allocation5 + $0x120] sm:$0xff]  ;;  %v2381_v57 = vpack.c.bf16 %v168_v50, %v164_v49  ;;  %v167_v58 = vld [vmem:[#allocation5 + $0x130] sm:$0xff]  ;;  %v170_v59 = vld [vmem:[#allocation5 + $0x148] sm:$0xff] }
  0x7d   :  { %2376 = vmatpush1.bf16.msra.mxu1 %v2375_v39  ;;  %2346 = vmatprep.subr.bf16.mxu0 %v2345_v40  ;;  %v174_v60 = vld [vmem:[#allocation5 + $0x168] sm:$0xff]  ;;  %v172_v61 = vld [vmem:[#allocation5 + $0x158] sm:$0xff]  ;;  %v2351_v63 = vpack.c.bf16 %v165_v55, %v161_v54  ;;  %v2383_v1 = vpack.c.bf16 %v167_v58, %v163_v56  ;;  %v169_v3 = vld [vmem:[#allocation5 + $0x140] sm:$0xff] }
  0x7e   :  { %2378 = vmatprep.subr.bf16.mxu1 %v2377_v44  ;;  %v176_v62 = vld [vmem:[#allocation5 + $0x178] sm:$0xff]  ;;  %v2353_v2 = vpack.c.bf16 %v174_v60, %v170_v59  ;;  %v173_v4 = vld [vmem:[#allocation5 + $0x160] sm:$0xff]  ;;  %v171_v5 = vld [vmem:[#allocation5 + $0x150] sm:$0xff] }
  0x7f   :  { %v2385_v6 = vpack.c.bf16 %v176_v62, %v172_v61  ;;  %v175_v7 = vld [vmem:[#allocation5 + $0x170] sm:$0xff]  ;;  %v178_v8 = vld [vmem:[#allocation5 + $0x188] sm:$0xff]  ;;  %v180_v10 = vld [vmem:[#allocation5 + $0x198] sm:$0xff]  ;;  %v2355_v12 = vpack.c.bf16 %v173_v4, %v169_v3 }
  0x80   :  { %2348 = vmatpush1.bf16.msra.mxu0 %v2347_v51  ;;  %v182_v9 = vld [vmem:[#allocation5 + $0x1a8] sm:$0xff]  ;;  %v184_v11 = vld [vmem:[#allocation5 + $0x1b8] sm:$0xff]  ;;  %v2387_v13 = vpack.c.bf16 %v175_v7, %v171_v5  ;;  %v177_v15 = vld [vmem:[#allocation5 + $0x180] sm:$0xff] }
  0x81   :  { %2380 = vmatpush1.bf16.msra.mxu1 %v2379_v52  ;;  %2350 = vmatprep.subr.bf16.mxu0 %v2349_v53  ;;  %v2357_v14 = vpack.c.bf16 %v182_v9, %v178_v8  ;;  %v181_v16 = vld [vmem:[#allocation5 + $0x1a0] sm:$0xff]  ;;  %v179_v17 = vld [vmem:[#allocation5 + $0x190] sm:$0xff]  ;;  %v2389_v18 = vpack.c.bf16 %v184_v11, %v180_v10  ;;  %v186_v20 = vld [vmem:[#allocation5 + $0x1c8] sm:$0xff] }
  0x82   :  { %2382 = vmatprep.subr.bf16.mxu1 %v2381_v57  ;;  %v183_v19 = vld [vmem:[#allocation5 + $0x1b0] sm:$0xff]  ;;  %v190_v21 = vld [vmem:[#allocation5 + $0x1e8] sm:$0xff]  ;;  %v188_v22 = vld [vmem:[#allocation5 + $0x1d8] sm:$0xff]  ;;  %v2359_v24 = vpack.c.bf16 %v181_v16, %v177_v15 }
  0x83   :  { %v192_v23 = vld [vmem:[#allocation5 + $0x1f8] sm:$0xff]  ;;  %v2391_v25 = vpack.c.bf16 %v183_v19, %v179_v17  ;;  %v2361_v26 = vpack.c.bf16 %v190_v21, %v186_v20  ;;  %v185_v27 = vld [vmem:[#allocation5 + $0x1c0] sm:$0xff]  ;;  %v187_v29 = vld [vmem:[#allocation5 + $0x1d0] sm:$0xff] }
  0x84   :  { %2352 = vmatpush1.bf16.msra.mxu0 %v2351_v63  ;;  %v189_v28 = vld [vmem:[#allocation5 + $0x1e0] sm:$0xff]  ;;  %v2393_v30 = vpack.c.bf16 %v192_v23, %v188_v22  ;;  %v191_v31 = vld [vmem:[#allocation5 + $0x1f0] sm:$0xff]  ;;  %v442_v32 = vld [vmem:[#allocation7 + $0x8] sm:$0xff] }
  0x85   :  { %2384 = vmatpush1.bf16.msra.mxu1 %v2383_v1  ;;  %2354 = vmatprep.subr.bf16.mxu0 %v2353_v2  ;;  %v446_v33 = vld [vmem:[#allocation7 + $0x28] sm:$0xff]  ;;  %v444_v34 = vld [vmem:[#allocation7 + $0x18] sm:$0xff]  ;;  %v2363_v36 = vpack.c.bf16 %v189_v28, %v185_v27  ;;  %v2395_v37 = vpack.c.bf16 %v191_v31, %v187_v29  ;;  %v441_v39 = vld [vmem:[#allocation7] sm:$0xff] }
  0x86   :  { %2386 = vmatprep.subr.bf16.mxu1 %v2385_v6  ;;  %v448_v35 = vld [vmem:[#allocation7 + $0x38] sm:$0xff]  ;;  %v3552_v38 = vpack.c.bf16 %v446_v33, %v442_v32  ;;  %v445_v40 = vld [vmem:[#allocation7 + $0x20] sm:$0xff]  ;;  %v443_v42 = vld [vmem:[#allocation7 + $0x10] sm:$0xff] }
  0x87   :  { %v3554_v41 = vpack.c.bf16 %v448_v35, %v444_v34  ;;  %v447_v43 = vld [vmem:[#allocation7 + $0x30] sm:$0xff]  ;;  %v450_v44 = vld [vmem:[#allocation7 + $0x48] sm:$0xff]  ;;  %v121_v46 = vld [vmem:[#allocation2] sm:$0xff]  ;;  %v3556_v47 = vpack.c.bf16 %v445_v40, %v441_v39 }
  0x88   :  { %2356 = vmatpush1.bf16.msra.mxu0 %v2355_v12  ;;  %v454_v45 = vld [vmem:[#allocation7 + $0x68] sm:$0xff]  ;;  %v452_v48 = vld [vmem:[#allocation7 + $0x58] sm:$0xff]  ;;  %v3559_v50 = vpack.c.bf16 %v447_v43, %v443_v42  ;;  %v449_v51 = vld [vmem:[#allocation7 + $0x40] sm:$0xff] }
  0x89   :  { %2388 = vmatpush1.bf16.msra.mxu1 %v2387_v13  ;;  %2358 = vmatprep.subr.bf16.mxu0 %v2357_v14  ;;  %v456_v49 = vld [vmem:[#allocation7 + $0x78] sm:$0xff]  ;;  %v453_v52 = vld [vmem:[#allocation7 + $0x60] sm:$0xff]  ;;  %v3562_v53 = vpack.c.bf16 %v454_v45, %v450_v44  ;;  %v451_v54 = vld [vmem:[#allocation7 + $0x50] sm:$0xff] }
  0x8a   :  { %2390 = vmatprep.subr.bf16.mxu1 %v2389_v18  ;;  %v455_v55 = vld [vmem:[#allocation7 + $0x70] sm:$0xff]  ;;  %v3564_v56 = vpack.c.bf16 %v456_v49, %v452_v48  ;;  %v458_v57 = vld [vmem:[#allocation7 + $0x88] sm:$0xff]  ;;  %v3567_v60 = vpack.c.bf16 %v453_v52, %v449_v51  ;;  %v460_v61 = vld [vmem:[#allocation7 + $0x98] sm:$0xff] }
  0x8b   :  { %v462_v58 = vld [vmem:[#allocation7 + $0xa8] sm:$0xff]  ;;  %v464_v62 = vld [vmem:[#allocation7 + $0xb8] sm:$0xff]  ;;  %v3571_v63 = vpack.c.bf16 %v455_v55, %v451_v54  ;;  %v457_v1 = vld [vmem:[#allocation7 + $0x80] sm:$0xff] }
  0x8c   :  { %2360 = vmatpush1.bf16.msra.mxu0 %v2359_v24  ;;  %v122_v59 = vld [vmem:[#allocation2 + $0x8] sm:$0xff]  ;;  %v461_v2 = vld [vmem:[#allocation7 + $0xa0] sm:$0xff]  ;;  %v3575_v3 = vpack.c.bf16 %v462_v58, %v458_v57  ;;  %v459_v4 = vld [vmem:[#allocation7 + $0x90] sm:$0xff]  ;;  %v3578_v6 = vpack.c.bf16 %v464_v62, %v460_v61 }
  0x8d   :  { %2392 = vmatpush1.bf16.msra.mxu1 %v2391_v25  ;;  %2362 = vmatprep.subr.bf16.mxu0 %v2361_v26  ;;  %v463_v5 = vld [vmem:[#allocation7 + $0xb0] sm:$0xff]  ;;  %v466_v7 = vld [vmem:[#allocation7 + $0xc8] sm:$0xff]  ;;  %v3581_v10 = vpack.c.bf16 %v461_v2, %v457_v1  ;;  %v468_v11 = vld [vmem:[#allocation7 + $0xd8] sm:$0xff] }
  0x8e   :  { %2394 = vmatprep.subr.bf16.mxu1 %v2393_v30  ;;  %v470_v8 = vld [vmem:[#allocation7 + $0xe8] sm:$0xff]  ;;  %v123_v9 = vld [vmem:[#allocation2 + $0x10] sm:$0xff]  ;;  %v472_v12 = vld [vmem:[#allocation7 + $0xf8] sm:$0xff]  ;;  %v3585_v13 = vpack.c.bf16 %v463_v5, %v459_v4 }
  0x8f   :  { %v465_v14 = vld [vmem:[#allocation7 + $0xc0] sm:$0xff]  ;;  %v3589_v16 = vpack.c.bf16 %v470_v8, %v466_v7  ;;  %v467_v17 = vld [vmem:[#allocation7 + $0xd0] sm:$0xff]  ;;  %v3592_v19 = vpack.c.bf16 %v472_v12, %v468_v11  ;;  %v474_v20 = vld [vmem:[#allocation7 + $0x108] sm:$0xff] }
  0x90   :  { %2364 = vmatpush1.bf16.msra.mxu0 %v2363_v36  ;;  %v469_v15 = vld [vmem:[#allocation7 + $0xe0] sm:$0xff]  ;;  %v471_v18 = vld [vmem:[#allocation7 + $0xf0] sm:$0xff]  ;;  %v478_v21 = vld [vmem:[#allocation7 + $0x128] sm:$0xff] }
  0x91   :  { %2396 = vmatpush1.bf16.msra.mxu1 %v2395_v37  ;;  %2398 = vmatprep.subr.bf16.mxu0 %v3552_v38  ;;  %v124_v22 = vld [vmem:[#allocation2 + $0x18] sm:$0xff]  ;;  %v3595_v23 = vpack.c.bf16 %v469_v15, %v465_v14  ;;  %v3599_v26 = vpack.c.bf16 %v471_v18, %v467_v17  ;;  %v473_v27 = vld [vmem:[#allocation7 + $0x100] sm:$0xff]  ;;  %v3603_v29 = vpack.c.bf16 %v478_v21, %v474_v20  ;;  %v475_v30 = vld [vmem:[#allocation7 + $0x110] sm:$0xff] }
  0x92   :  { %2430 = vmatprep.subr.bf16.mxu1 %v3554_v41  ;;  %v476_v24 = vld [vmem:[#allocation7 + $0x118] sm:$0xff]  ;;  %v477_v28 = vld [vmem:[#allocation7 + $0x120] sm:$0xff]  ;;  %v479_v31 = vld [vmem:[#allocation7 + $0x130] sm:$0xff] }
  0x93   :  { %280 = vmatmul.mubr.f32.vlgmr.msra.gmra.mrb[0].mxu0 %v121_v46  ;;  %v480_v25 = vld [vmem:[#allocation7 + $0x138] sm:$0xff]  ;;  %v482_v33 = vld [vmem:[#allocation7 + $0x148] sm:$0xff]  ;;  %v125_v35 = vld [vmem:[#allocation2 + $0x20] sm:$0xff]  ;;  %v3609_v36 = vpack.c.bf16 %v477_v28, %v473_v27  ;;  %v3613_v40 = vpack.c.bf16 %v479_v31, %v475_v30  ;;  %v195_v28 = vlaneseq }
  0x94   :  { %393 = vmatmul.mubr.f32.vlgmr.msra.gmra.mrb[0].mxu1 %v121_v46  ;;  %2400 = vmatpush1.bf16.msra.mxu0 %v3556_v47  ;;  %v3606_v32 = vpack.c.bf16 %v480_v25, %v476_v24  ;;  %v486_v34 = vld [vmem:[#allocation7 + $0x168] sm:$0xff]  ;;  %v484_v37 = vld [vmem:[#allocation7 + $0x158] sm:$0xff]  ;;  %v481_v42 = vld [vmem:[#allocation7 + $0x140] sm:$0xff] }
  0x95   :  { %2432 = vmatpush1.bf16.msra.mxu1 %v3559_v50  ;;  %285 = vmatprep.mubr.f32.mxu0 %v3398_v0  ;;  %v488_v39 = vld [vmem:[#allocation7 + $0x178] sm:$0xff]  ;;  %v485_v43 = vld [vmem:[#allocation7 + $0x160] sm:$0xff]  ;;  %v3617_v44 = vpack.c.bf16 %v486_v34, %v482_v33  ;;  %v483_v45 = vld [vmem:[#allocation7 + $0x150] sm:$0xff]  ;;  %v3702_v30 = vshrl.u32 %v195_v28, 7 }
  0x96   :  { %398 = vmatprep.mubr.f32.mxu1 %v3398_v0  ;;  %2402 = vmatprep.subr.bf16.mxu0 %v3562_v53  ;;  %v487_v46 = vld [vmem:[#allocation7 + $0x170] sm:$0xff]  ;;  %v3620_v48 = vpack.c.bf16 %v488_v39, %v484_v37  ;;  %v490_v49 = vld [vmem:[#allocation7 + $0x188] sm:$0xff]  ;;  %v3623_v54 = vpack.c.bf16 %v485_v43, %v481_v42  ;;  %v492_v55 = vld [vmem:[#allocation7 + $0x198] sm:$0xff] }
  0x97   :  { %286 = vmatmul.mubr.f32.gmra.mrb[2].mxu0 %v122_v59  ;;  %2434 = vmatprep.subr.bf16.mxu1 %v3564_v56  ;;  %v494_v51 = vld [vmem:[#allocation7 + $0x1a8] sm:$0xff]  ;;  %v496_v57 = vld [vmem:[#allocation7 + $0x1b8] sm:$0xff]  ;;  %v3627_v58 = vpack.c.bf16 %v487_v46, %v483_v45  ;;  %v493_v61 = vld [vmem:[#allocation7 + $0x1a0] sm:$0xff]  ;;  %v197_v31 = vsub.s32 0, %v3702_v30  ;;  %v201_v34 = vsub.s32 1, %v3702_v30  ;;  %v209_v42 = vsub.s32 3, %v3702_v30 }
  0x98   :  { %399 = vmatmul.mubr.f32.gmra.mrb[2].mxu1 %v122_v59  ;;  %2404 = vmatpush1.bf16.msra.mxu0 %v3567_v60  ;;  %v126_v52 = vld [vmem:[#allocation2 + $0x28] sm:$0xff]  ;;  %v489_v59 = vld [vmem:[#allocation7 + $0x180] sm:$0xff]  ;;  %v3631_v62 = vpack.c.bf16 %v494_v51, %v490_v49  ;;  %v491_v1 = vld [vmem:[#allocation7 + $0x190] sm:$0xff]  ;;  %v3634_v4 = vpack.c.bf16 %v496_v57, %v492_v55 }
  0x99   :  { %2436 = vmatpush1.bf16.msra.mxu1 %v3571_v63  ;;  %291 = vmatprep.mubr.f32.mxu0 %v3398_v0  ;;  %v495_v2 = vld [vmem:[#allocation7 + $0x1b0] sm:$0xff]  ;;  %v498_v5 = vld [vmem:[#allocation7 + $0x1c8] sm:$0xff]  ;;  %v500_v11 = vld [vmem:[#allocation7 + $0x1d8] sm:$0xff] }
  0x9a   :  { %404 = vmatprep.mubr.f32.mxu1 %v3398_v0  ;;  %2406 = vmatprep.subr.bf16.mxu0 %v3575_v3  ;;  %v502_v7 = vld [vmem:[#allocation7 + $0x1e8] sm:$0xff]  ;;  %v127_v8 = vld [vmem:[#allocation2 + $0x30] sm:$0xff]  ;;  %v504_v12 = vld [vmem:[#allocation7 + $0x1f8] sm:$0xff]  ;;  %v3641_v14 = vpack.c.bf16 %v495_v2, %v491_v1 }
  0x9b   :  { %292 = vmatmul.mubr.f32.gmra.mrb[4].mxu0 %v123_v9  ;;  %2438 = vmatprep.subr.bf16.mxu1 %v3578_v6  ;;  %v497_v15 = vld [vmem:[#allocation7 + $0x1c0] sm:$0xff]  ;;  %v3645_v18 = vpack.c.bf16 %v502_v7, %v498_v5  ;;  %v499_v20 = vld [vmem:[#allocation7 + $0x1d0] sm:$0xff]  ;;  %v128_v24 = vld [vmem:[#allocation2 + $0x38] sm:$0xff] }
  0x9c   :  { %405 = vmatmul.mubr.f32.gmra.mrb[4].mxu1 %v123_v9  ;;  %2408 = vmatpush1.bf16.msra.mxu0 %v3581_v10  ;;  %v3637_v9 = vpack.c.bf16 %v493_v61, %v489_v59  ;;  %v501_v17 = vld [vmem:[#allocation7 + $0x1e0] sm:$0xff]  ;;  %v503_v21 = vld [vmem:[#allocation7 + $0x1f0] sm:$0xff]  ;;  %v205_v59 = vsub.s32 2, %v3702_v30 }
  0x9d   :  { %2440 = vmatpush1.bf16.msra.mxu1 %v3585_v13  ;;  %297 = vmatprep.mubr.f32.mxu0 %v3398_v0  ;;  %v3651_v25 = vpack.c.bf16 %v501_v17, %v497_v15  ;;  %v3655_v27 = vpack.c.bf16 %v503_v21, %v499_v20  ;;  %v193_v33 = vld [vmem:[%s4044_s3] sm:$0xf] }
  0x9e   :  { %410 = vmatprep.mubr.f32.mxu1 %v3398_v0  ;;  %2410 = vmatprep.subr.bf16.mxu0 %v3589_v16  ;;  %v3715_v37 = vrot.slane %v193_v33, %v201_v34  ;;  %v3720_v57 = vrot.slane %v193_v33, %v209_v42  ;;  %v3724_v1 = vrot.slane %v193_v33, %v205_v59 }
  0x9f   :  { %298 = vmatmul.mubr.f32.gmra.mrb[6].mxu0 %v124_v22  ;;  %2442 = vmatprep.subr.bf16.mxu1 %v3592_v19 }
  0xa0   :  { %411 = vmatmul.mubr.f32.gmra.mrb[6].mxu1 %v124_v22  ;;  %2412 = vmatpush1.bf16.msra.mxu0 %v3595_v23  ;;  %v3648_v22 = vpack.c.bf16 %v504_v12, %v500_v11 }
  0xa1   :  { %2444 = vmatpush1.bf16.msra.mxu1 %v3599_v26  ;;  %303 = vmatprep.mubr.f32.mxu0 %v3398_v0 }
  0xa2   :  { %416 = vmatprep.mubr.f32.mxu1 %v3398_v0  ;;  %2414 = vmatprep.subr.bf16.mxu0 %v3603_v29 }
  0xa3   :  { %304 = vmatmul.mubr.f32.gmra.mrb[8].mxu0 %v125_v35  ;;  %2446 = vmatprep.subr.bf16.mxu1 %v3606_v32 }
  0xa4   :  { %417 = vmatmul.mubr.f32.gmra.mrb[8].mxu1 %v125_v35  ;;  %2416 = vmatpush1.bf16.msra.mxu0 %v3609_v36  ;;  %v3711_v35 = vrot.slane %v193_v33, %v197_v31 }
  0xa5   :  { %2448 = vmatpush1.bf16.msra.mxu1 %v3613_v40  ;;  %309 = vmatprep.mubr.f32.mxu0 %v3398_v0 }
  0xa6   :  { %422 = vmatprep.mubr.f32.mxu1 %v3398_v0  ;;  %2418 = vmatprep.subr.bf16.mxu0 %v3617_v44 }
  0xa7   :  { %310 = vmatmul.mubr.f32.gmra.mrb[10].mxu0 %v126_v52  ;;  %2450 = vmatprep.subr.bf16.mxu1 %v3620_v48 }
  0xa8   :  { %423 = vmatmul.mubr.f32.gmra.mrb[10].mxu1 %v126_v52  ;;  %2420 = vmatpush1.bf16.msra.mxu0 %v3623_v54 }
  0xa9   :  { %2452 = vmatpush1.bf16.msra.mxu1 %v3627_v58  ;;  %315 = vmatprep.mubr.f32.mxu0 %v3398_v0 }
  0xaa   :  { %428 = vmatprep.mubr.f32.mxu1 %v3398_v0  ;;  %2422 = vmatprep.subr.bf16.mxu0 %v3631_v62 }
  0xab   :  { %316 = vmatmul.mubr.f32.gmra.mrb[12].mxu0 %v127_v8  ;;  %2454 = vmatprep.subr.bf16.mxu1 %v3634_v4 }
  0xac   :  { %429 = vmatmul.mubr.f32.gmra.mrb[12].mxu1 %v127_v8  ;;  %2424 = vmatpush1.bf16.msra.mxu0 %v3637_v9 }
  0xad   :  { %2456 = vmatpush1.bf16.msra.mxu1 %v3641_v14  ;;  %321 = vmatprep.mubr.f32.mxu0 %v3398_v0 }
  0xae   :  { %434 = vmatprep.mubr.f32.mxu1 %v3398_v0  ;;  %2426 = vmatprep.subr.bf16.mxu0 %v3645_v18 }
  0xaf   :  { %322 = vmatmul.mubr.f32.gmra.mrb[14].mxu0 %v128_v24  ;;  %2458 = vmatprep.subr.bf16.mxu1 %v3648_v22 }
  0xb0   :  { %435 = vmatmul.mubr.f32.gmra.mrb[14].mxu1 %v128_v24  ;;  %2428 = vmatpush1.bf16.msra.mxu0 %v3651_v25 }
  0xb1   :  { %2460 = vmatpush1.bf16.msra.mxu1 %v3655_v27  ;;  %569 = vmatprep.mubr.f32.mxu0 %v3398_v0 }
  0xb2   :  { %640 = vmatprep.mubr.f32.mxu1 %v3398_v0  ;;  %2462 = vmatprep.subr.bf16.mxu0 %v3552_v38 }
  0xb3   :  { %570 = vmatmul.mubr.f32.vlgmr.msra.gmra.mrb[0].mxu0 %v3398_v0  ;;  %2494 = vmatprep.subr.bf16.mxu1 %v3554_v41 }
  0xb4   :  { %641 = vmatmul.mubr.f32.vlgmr.msra.gmra.mrb[0].mxu1 %v3398_v0  ;;  %2464 = vmatpush1.bf16.msra.mxu0 %v3556_v47 }
  0xb5   :  { %2496 = vmatpush1.bf16.msra.mxu1 %v3559_v50  ;;  %2466 = vmatprep.subr.bf16.mxu0 %v3562_v53 }
  0xb6   :  { %2498 = vmatprep.subr.bf16.mxu1 %v3564_v56  ;;  %739 = vmatprep.mubr.f32.mxu0 %v3398_v0 }
  0xb7   :  { %810 = vmatprep.mubr.f32.mxu1 %v3398_v0 }
  0xb8   :  { %2468 = vmatpush1.bf16.msra.mxu0 %v3567_v60 }
  0xb9   :  { %2500 = vmatpush1.bf16.msra.mxu1 %v3571_v63  ;;  %2470 = vmatprep.subr.bf16.mxu0 %v3575_v3 }
  0xba   :  { %2502 = vmatprep.subr.bf16.mxu1 %v3578_v6 }
  0xbc   :  { %2472 = vmatpush1.bf16.msra.mxu0 %v3581_v10 }
  0xbd   :  { %2504 = vmatpush1.bf16.msra.mxu1 %v3585_v13  ;;  %2474 = vmatprep.subr.bf16.mxu0 %v3589_v16 }
  0xbe   :  { %2506 = vmatprep.subr.bf16.mxu1 %v3592_v19 }
  0xc0   :  { %2476 = vmatpush1.bf16.msra.mxu0 %v3595_v23 }
  0xc1   :  { %2508 = vmatpush1.bf16.msra.mxu1 %v3599_v26  ;;  %2478 = vmatprep.subr.bf16.mxu0 %v3603_v29 }
  0xc2   :  { %2510 = vmatprep.subr.bf16.mxu1 %v3606_v32 }
  0xc4   :  { %2480 = vmatpush1.bf16.msra.mxu0 %v3609_v36 }
  0xc5   :  { %2512 = vmatpush1.bf16.msra.mxu1 %v3613_v40  ;;  %2482 = vmatprep.subr.bf16.mxu0 %v3617_v44 }
  0xc6   :  { %2514 = vmatprep.subr.bf16.mxu1 %v3620_v48 }
  0xc8   :  { %2484 = vmatpush1.bf16.msra.mxu0 %v3623_v54 }
  0xc9   :  { %2516 = vmatpush1.bf16.msra.mxu1 %v3627_v58  ;;  %2486 = vmatprep.subr.bf16.mxu0 %v3631_v62 }
  0xca   :  { %2518 = vmatprep.subr.bf16.mxu1 %v3634_v4 }
  0xcc   :  { %2488 = vmatpush1.bf16.msra.mxu0 %v3637_v9 }
  0xcd   :  { %2520 = vmatpush1.bf16.msra.mxu1 %v3641_v14  ;;  %2490 = vmatprep.subr.bf16.mxu0 %v3645_v18 }
  0xce   :  { %2522 = vmatprep.subr.bf16.mxu1 %v3648_v22 }
  0xd0   :  { %2492 = vmatpush1.bf16.msra.mxu0 %v3651_v25 }
  0xd1   :  { %2524 = vmatpush1.bf16.msra.mxu1 %v3655_v27  ;;  %2526 = vmatprep.subr.bf16.mxu0 %v3552_v38 }
  0xd2   :  { %2558 = vmatprep.subr.bf16.mxu1 %v3554_v41 }
 0x186   :  { %v571_v39 = vpop.f32.mrb[0].mxu0 }
 0x187   :  { %v2989_v43 = vadd.f32 %v571_v39, %v3711_v35  ;;  %v642_v45 = vpop.f32.mrb[0].mxu1  ;;  %v573_v46 = vpop.f32.mrb[1].mxu0 }
 0x188   :  { %v2990_v49 = vadd.f32 %v573_v46, %v3715_v37  ;;  %v644_v51 = vpop.f32.mrb[1].mxu1  ;;  %v3005_v5 = vadd.f32 %v642_v45, %v3724_v1 }
 0x189   :  { %v2203_v52 = vmul.f32 -1.442695, %v2989_v43  ;;  %v3006_v61 = vadd.f32 %v644_v51, %v3720_v57 }
 0x18a   :  { %v2204_v55 = vmul.f32 -1.442695, %v2990_v49 }
 0x18b   :  { %3070 = vpow2.f32 %v2203_v52  ;;  %v2205_v2 = vmul.f32 -1.442695, %v3006_v61 }
 0x18c   :  { %3072 = vpow2.f32 %v2204_v55 }
 0x18d   :  { %3074 = vpow2.f32 %v2205_v2 }
 0x18e   :  { %3076 = vtanh.f32 %v3005_v5 }
 0x195   :  { %v3071_v7 = vpop.eup %3070 }
 0x196   :  { %v3073_v8 = vpop.eup %3072  ;;  %v654_v11 = vadd.f32 1.0, %v3071_v7 }
 0x197   :  { %v660_v12 = vadd.f32 1.0, %v3073_v8  ;;  %v3075_v15 = vpop.eup %3074 }
 0x198   :  { %3078 = vrcp.f32 %v654_v11  ;;  %v3077_v17 = vpop.eup %3076  ;;  %v667_v28 = vadd.f32 1.0, %v3075_v15 }
 0x199   :  { %3080 = vrcp.f32 %v660_v12 }
 0x19a   :  { %3082 = vrcp.f32 %v667_v28 }
 0x1a2   :  { %v3079_v20 = vpop.eup %3078 }
 0x1a3   :  { %v3081_v21 = vpop.eup %3080  ;;  %v671_v24 = vmul.f32 %v3079_v20, %v3077_v17 }
 0x1a4   :  { %v670_v39 = vmul.f32 0.0, %v3081_v21  ;;  %v3083_v42 = vpop.eup %3082 }
 0x1a6   :  { %v3727_v33 = vadd.f32 %v671_v24, %v670_v39 }
 0x1a8   :  { %3084 = vtanh.f32 %v3727_v33 }
 0x1b2   :  { %v3085_v43 = vpop.eup %3084 }
 0x1b3   :  { %v674_v45 = vmul.f32 %v3085_v43, %v3083_v42 }
 0x1b5   :  { %740 = vmatmul.mubr.f32.vlgmr.msra.gmra.mrb[2].mxu0 %v674_v45  ;;  %811 = vmatmul.mubr.f32.vlgmr.msra.gmra.mrb[2].mxu1 %v674_v45 }
 0x1b6   :  { %2528 = vmatpush1.bf16.msra.mxu0 %v3556_v47  ;;  %2560 = vmatpush1.bf16.msra.mxu1 %v3559_v50 }
 0x1b7   :  { %2530 = vmatprep.subr.bf16.mxu0 %v3562_v53  ;;  %2562 = vmatprep.subr.bf16.mxu1 %v3564_v56 }
 0x1b8   :  { %909 = vmatprep.mubr.f32.mxu0 %v3398_v0  ;;  %980 = vmatprep.mubr.f32.mxu1 %v3398_v0 }
 0x1ba   :  { %2532 = vmatpush1.bf16.msra.mxu0 %v3567_v60  ;;  %2564 = vmatpush1.bf16.msra.mxu1 %v3571_v63 }
 0x1bb   :  { %2534 = vmatprep.subr.bf16.mxu0 %v3575_v3  ;;  %2566 = vmatprep.subr.bf16.mxu1 %v3578_v6 }
 0x1be   :  { %2536 = vmatpush1.bf16.msra.mxu0 %v3581_v10  ;;  %2568 = vmatpush1.bf16.msra.mxu1 %v3585_v13 }
 0x1bf   :  { %2538 = vmatprep.subr.bf16.mxu0 %v3589_v16  ;;  %2570 = vmatprep.subr.bf16.mxu1 %v3592_v19 }
 0x1c2   :  { %2540 = vmatpush1.bf16.msra.mxu0 %v3595_v23  ;;  %2572 = vmatpush1.bf16.msra.mxu1 %v3599_v26 }
 0x1c3   :  { %2542 = vmatprep.subr.bf16.mxu0 %v3603_v29  ;;  %2574 = vmatprep.subr.bf16.mxu1 %v3606_v32 }
 0x1c6   :  { %2544 = vmatpush1.bf16.msra.mxu0 %v3609_v36  ;;  %2576 = vmatpush1.bf16.msra.mxu1 %v3613_v40 }
 0x1c7   :  { %2546 = vmatprep.subr.bf16.mxu0 %v3617_v44  ;;  %2578 = vmatprep.subr.bf16.mxu1 %v3620_v48 }
 0x1ca   :  { %2548 = vmatpush1.bf16.msra.mxu0 %v3623_v54  ;;  %2580 = vmatpush1.bf16.msra.mxu1 %v3627_v58 }
 0x1cb   :  { %2550 = vmatprep.subr.bf16.mxu0 %v3631_v62  ;;  %2582 = vmatprep.subr.bf16.mxu1 %v3634_v4 }
 0x1ce   :  { %2552 = vmatpush1.bf16.msra.mxu0 %v3637_v9  ;;  %2584 = vmatpush1.bf16.msra.mxu1 %v3641_v14 }
 0x1cf   :  { %2554 = vmatprep.subr.bf16.mxu0 %v3645_v18  ;;  %2586 = vmatprep.subr.bf16.mxu1 %v3648_v22 }
 0x1d2   :  { %2556 = vmatpush1.bf16.msra.mxu0 %v3651_v25  ;;  %2588 = vmatpush1.bf16.msra.mxu1 %v3655_v27 }
 0x1d3   :  { %2590 = vmatprep.subr.bf16.mxu0 %v3552_v38  ;;  %2622 = vmatprep.subr.bf16.mxu1 %v3554_v41 }
 0x288   :  { %v741_v46 = vpop.f32.mrb[2].mxu0  ;;  %v812_v49 = vpop.f32.mrb[2].mxu1 }
 0x289   :  { %v2991_v51 = vadd.f32 %v741_v46, %v3711_v35  ;;  %v743_v52 = vpop.f32.mrb[3].mxu0  ;;  %v814_v55 = vpop.f32.mrb[3].mxu1  ;;  %v3007_v8 = vadd.f32 %v812_v49, %v3724_v1 }
 0x28a   :  { %v2992_v59 = vadd.f32 %v743_v52, %v3715_v37  ;;  %v3008_v5 = vadd.f32 %v814_v55, %v3720_v57 }
 0x28b   :  { %v2206_v61 = vmul.f32 -1.442695, %v2991_v51 }
 0x28c   :  { %v2207_v2 = vmul.f32 -1.442695, %v2992_v59  ;;  %v2208_v7 = vmul.f32 -1.442695, %v3008_v5 }
 0x28d   :  { %3086 = vpow2.f32 %v2206_v61 }
 0x28e   :  { %3088 = vpow2.f32 %v2207_v2 }
 0x28f   :  { %3090 = vpow2.f32 %v2208_v7 }
 0x290   :  { %3092 = vtanh.f32 %v3007_v8 }
 0x297   :  { %v3087_v11 = vpop.eup %3086 }
 0x298   :  { %v3089_v12 = vpop.eup %3088  ;;  %v824_v15 = vadd.f32 1.0, %v3087_v11 }
 0x299   :  { %v830_v17 = vadd.f32 1.0, %v3089_v12  ;;  %v3091_v20 = vpop.eup %3090 }
 0x29a   :  { %3094 = vrcp.f32 %v824_v15  ;;  %v3093_v21 = vpop.eup %3092  ;;  %v837_v42 = vadd.f32 1.0, %v3091_v20 }
 0x29b   :  { %3096 = vrcp.f32 %v830_v17 }
 0x29c   :  { %3098 = vrcp.f32 %v837_v42 }
 0x2a4   :  { %v3095_v24 = vpop.eup %3094 }
 0x2a5   :  { %v3097_v28 = vpop.eup %3096  ;;  %v841_v39 = vmul.f32 %v3095_v24, %v3093_v21 }
 0x2a6   :  { %v840_v43 = vmul.f32 %v3097_v28, %v3727_v33  ;;  %v3099_v46 = vpop.eup %3098 }
 0x2a8   :  { %v3769_v45 = vadd.f32 %v841_v39, %v840_v43 }
 0x2aa   :  { %3100 = vtanh.f32 %v3769_v45 }
 0x2b4   :  { %v3101_v49 = vpop.eup %3100 }
 0x2b5   :  { %v844_v51 = vmul.f32 %v3101_v49, %v3099_v46 }
 0x2b7   :  { %910 = vmatmul.mubr.f32.vlgmr.msra.gmra.mrb[4].mxu0 %v844_v51  ;;  %981 = vmatmul.mubr.f32.vlgmr.msra.gmra.mrb[4].mxu1 %v844_v51 }
 0x2b8   :  { %2592 = vmatpush1.bf16.msra.mxu0 %v3556_v47  ;;  %2624 = vmatpush1.bf16.msra.mxu1 %v3559_v50 }
 0x2b9   :  { %2594 = vmatprep.subr.bf16.mxu0 %v3562_v53  ;;  %2626 = vmatprep.subr.bf16.mxu1 %v3564_v56 }
 0x2ba   :  { %1079 = vmatprep.mubr.f32.mxu0 %v3398_v0  ;;  %1150 = vmatprep.mubr.f32.mxu1 %v3398_v0 }
 0x2bc   :  { %2596 = vmatpush1.bf16.msra.mxu0 %v3567_v60  ;;  %2628 = vmatpush1.bf16.msra.mxu1 %v3571_v63 }
 0x2bd   :  { %2598 = vmatprep.subr.bf16.mxu0 %v3575_v3  ;;  %2630 = vmatprep.subr.bf16.mxu1 %v3578_v6 }
 0x2c0   :  { %2600 = vmatpush1.bf16.msra.mxu0 %v3581_v10  ;;  %2632 = vmatpush1.bf16.msra.mxu1 %v3585_v13 }
 0x2c1   :  { %2602 = vmatprep.subr.bf16.mxu0 %v3589_v16  ;;  %2634 = vmatprep.subr.bf16.mxu1 %v3592_v19 }
 0x2c4   :  { %2604 = vmatpush1.bf16.msra.mxu0 %v3595_v23  ;;  %2636 = vmatpush1.bf16.msra.mxu1 %v3599_v26 }
 0x2c5   :  { %2606 = vmatprep.subr.bf16.mxu0 %v3603_v29  ;;  %2638 = vmatprep.subr.bf16.mxu1 %v3606_v32 }
 0x2c8   :  { %2608 = vmatpush1.bf16.msra.mxu0 %v3609_v36  ;;  %2640 = vmatpush1.bf16.msra.mxu1 %v3613_v40 }
 0x2c9   :  { %2610 = vmatprep.subr.bf16.mxu0 %v3617_v44  ;;  %2642 = vmatprep.subr.bf16.mxu1 %v3620_v48 }
 0x2cc   :  { %2612 = vmatpush1.bf16.msra.mxu0 %v3623_v54  ;;  %2644 = vmatpush1.bf16.msra.mxu1 %v3627_v58 }
 0x2cd   :  { %2614 = vmatprep.subr.bf16.mxu0 %v3631_v62  ;;  %2646 = vmatprep.subr.bf16.mxu1 %v3634_v4 }
 0x2d0   :  { %2616 = vmatpush1.bf16.msra.mxu0 %v3637_v9  ;;  %2648 = vmatpush1.bf16.msra.mxu1 %v3641_v14 }
 0x2d1   :  { %2618 = vmatprep.subr.bf16.mxu0 %v3645_v18  ;;  %2650 = vmatprep.subr.bf16.mxu1 %v3648_v22 }
 0x2d4   :  { %2620 = vmatpush1.bf16.msra.mxu0 %v3651_v25  ;;  %2652 = vmatpush1.bf16.msra.mxu1 %v3655_v27 }
 0x2d5   :  { %2654 = vmatprep.subr.bf16.mxu0 %v3552_v38  ;;  %2686 = vmatprep.subr.bf16.mxu1 %v3554_v41 }
 0x38a   :  { %v911_v33 = vpop.f32.mrb[4].mxu0  ;;  %v982_v52 = vpop.f32.mrb[4].mxu1 }
 0x38b   :  { %v2993_v55 = vadd.f32 %v911_v33, %v3711_v35  ;;  %v913_v59 = vpop.f32.mrb[5].mxu0  ;;  %v984_v61 = vpop.f32.mrb[5].mxu1  ;;  %v3009_v12 = vadd.f32 %v982_v52, %v3724_v1 }
 0x38c   :  { %v2994_v2 = vadd.f32 %v913_v59, %v3715_v37  ;;  %v3010_v8 = vadd.f32 %v984_v61, %v3720_v57 }
 0x38d   :  { %v2209_v5 = vmul.f32 -1.442695, %v2993_v55 }
 0x38e   :  { %v2210_v7 = vmul.f32 -1.442695, %v2994_v2  ;;  %v2211_v11 = vmul.f32 -1.442695, %v3010_v8 }
 0x38f   :  { %3102 = vpow2.f32 %v2209_v5 }
 0x390   :  { %3104 = vpow2.f32 %v2210_v7 }
 0x391   :  { %3106 = vpow2.f32 %v2211_v11 }
 0x392   :  { %3108 = vtanh.f32 %v3009_v12 }
 0x399   :  { %v3103_v15 = vpop.eup %3102 }
 0x39a   :  { %v3105_v17 = vpop.eup %3104  ;;  %v994_v20 = vadd.f32 1.0, %v3103_v15 }
 0x39b   :  { %v1000_v21 = vadd.f32 1.0, %v3105_v17  ;;  %v3107_v24 = vpop.eup %3106 }
 0x39c   :  { %3110 = vrcp.f32 %v994_v20  ;;  %v3109_v28 = vpop.eup %3108  ;;  %v1007_v46 = vadd.f32 1.0, %v3107_v24 }
 0x39d   :  { %3112 = vrcp.f32 %v1000_v21 }
 0x39e   :  { %3114 = vrcp.f32 %v1007_v46 }
 0x3a6   :  { %v3111_v39 = vpop.eup %3110 }
 0x3a7   :  { %v3113_v42 = vpop.eup %3112  ;;  %v1011_v43 = vmul.f32 %v3111_v39, %v3109_v28 }
 0x3a8   :  { %v1010_v49 = vmul.f32 %v3113_v42, %v3769_v45  ;;  %v3115_v33 = vpop.eup %3114 }
 0x3aa   :  { %v3811_v51 = vadd.f32 %v1011_v43, %v1010_v49 }
 0x3ac   :  { %3116 = vtanh.f32 %v3811_v51 }
 0x3b6   :  { %v3117_v52 = vpop.eup %3116 }
 0x3b7   :  { %v1014_v55 = vmul.f32 %v3117_v52, %v3115_v33 }
 0x3b9   :  { %1080 = vmatmul.mubr.f32.vlgmr.msra.gmra.mrb[6].mxu0 %v1014_v55  ;;  %1151 = vmatmul.mubr.f32.vlgmr.msra.gmra.mrb[6].mxu1 %v1014_v55 }
 0x3ba   :  { %2656 = vmatpush1.bf16.msra.mxu0 %v3556_v47  ;;  %2688 = vmatpush1.bf16.msra.mxu1 %v3559_v50 }
 0x3bb   :  { %2658 = vmatprep.subr.bf16.mxu0 %v3562_v53  ;;  %2690 = vmatprep.subr.bf16.mxu1 %v3564_v56 }
 0x3bc   :  { %1249 = vmatprep.mubr.f32.mxu0 %v3398_v0  ;;  %1320 = vmatprep.mubr.f32.mxu1 %v3398_v0 }
 0x3be   :  { %2660 = vmatpush1.bf16.msra.mxu0 %v3567_v60  ;;  %2692 = vmatpush1.bf16.msra.mxu1 %v3571_v63 }
 0x3bf   :  { %2662 = vmatprep.subr.bf16.mxu0 %v3575_v3  ;;  %2694 = vmatprep.subr.bf16.mxu1 %v3578_v6 }
 0x3c2   :  { %2664 = vmatpush1.bf16.msra.mxu0 %v3581_v10  ;;  %2696 = vmatpush1.bf16.msra.mxu1 %v3585_v13 }
 0x3c3   :  { %2666 = vmatprep.subr.bf16.mxu0 %v3589_v16  ;;  %2698 = vmatprep.subr.bf16.mxu1 %v3592_v19 }
 0x3c6   :  { %2668 = vmatpush1.bf16.msra.mxu0 %v3595_v23  ;;  %2700 = vmatpush1.bf16.msra.mxu1 %v3599_v26 }
 0x3c7   :  { %2670 = vmatprep.subr.bf16.mxu0 %v3603_v29  ;;  %2702 = vmatprep.subr.bf16.mxu1 %v3606_v32 }
 0x3ca   :  { %2672 = vmatpush1.bf16.msra.mxu0 %v3609_v36  ;;  %2704 = vmatpush1.bf16.msra.mxu1 %v3613_v40 }
 0x3cb   :  { %2674 = vmatprep.subr.bf16.mxu0 %v3617_v44  ;;  %2706 = vmatprep.subr.bf16.mxu1 %v3620_v48 }
 0x3ce   :  { %2676 = vmatpush1.bf16.msra.mxu0 %v3623_v54  ;;  %2708 = vmatpush1.bf16.msra.mxu1 %v3627_v58 }
 0x3cf   :  { %2678 = vmatprep.subr.bf16.mxu0 %v3631_v62  ;;  %2710 = vmatprep.subr.bf16.mxu1 %v3634_v4 }
 0x3d2   :  { %2680 = vmatpush1.bf16.msra.mxu0 %v3637_v9  ;;  %2712 = vmatpush1.bf16.msra.mxu1 %v3641_v14 }
 0x3d3   :  { %2682 = vmatprep.subr.bf16.mxu0 %v3645_v18  ;;  %2714 = vmatprep.subr.bf16.mxu1 %v3648_v22 }
 0x3d6   :  { %2684 = vmatpush1.bf16.msra.mxu0 %v3651_v25  ;;  %2716 = vmatpush1.bf16.msra.mxu1 %v3655_v27 }
 0x3d7   :  { %2718 = vmatprep.subr.bf16.mxu0 %v3552_v38  ;;  %2750 = vmatprep.subr.bf16.mxu1 %v3554_v41 }
 0x48c   :  { %v1081_v45 = vpop.f32.mrb[6].mxu0  ;;  %v1152_v59 = vpop.f32.mrb[6].mxu1 }
 0x48d   :  { %v2995_v61 = vadd.f32 %v1081_v45, %v3711_v35  ;;  %v1083_v2 = vpop.f32.mrb[7].mxu0  ;;  %v1154_v5 = vpop.f32.mrb[7].mxu1  ;;  %v3011_v17 = vadd.f32 %v1152_v59, %v3724_v1 }
 0x48e   :  { %v2996_v7 = vadd.f32 %v1083_v2, %v3715_v37  ;;  %v3012_v12 = vadd.f32 %v1154_v5, %v3720_v57 }
 0x48f   :  { %v2212_v8 = vmul.f32 -1.442695, %v2995_v61 }
 0x490   :  { %v2213_v11 = vmul.f32 -1.442695, %v2996_v7  ;;  %v2214_v15 = vmul.f32 -1.442695, %v3012_v12 }
 0x491   :  { %3118 = vpow2.f32 %v2212_v8 }
 0x492   :  { %3120 = vpow2.f32 %v2213_v11 }
 0x493   :  { %3122 = vpow2.f32 %v2214_v15 }
 0x494   :  { %3124 = vtanh.f32 %v3011_v17 }
 0x49b   :  { %v3119_v20 = vpop.eup %3118 }
 0x49c   :  { %v3121_v21 = vpop.eup %3120  ;;  %v1164_v24 = vadd.f32 1.0, %v3119_v20 }
 0x49d   :  { %v1170_v28 = vadd.f32 1.0, %v3121_v21  ;;  %v3123_v39 = vpop.eup %3122 }
 0x49e   :  { %3126 = vrcp.f32 %v1164_v24  ;;  %v3125_v42 = vpop.eup %3124  ;;  %v1177_v33 = vadd.f32 1.0, %v3123_v39 }
 0x49f   :  { %3128 = vrcp.f32 %v1170_v28 }
 0x4a0   :  { %3130 = vrcp.f32 %v1177_v33 }
 0x4a8   :  { %v3127_v43 = vpop.eup %3126 }
 0x4a9   :  { %v3129_v46 = vpop.eup %3128  ;;  %v1181_v49 = vmul.f32 %v3127_v43, %v3125_v42 }
 0x4aa   :  { %v1180_v52 = vmul.f32 %v3129_v46, %v3811_v51  ;;  %v3131_v45 = vpop.eup %3130 }
 0x4ac   :  { %v3853_v55 = vadd.f32 %v1181_v49, %v1180_v52 }
 0x4ae   :  { %3132 = vtanh.f32 %v3853_v55 }
 0x4b8   :  { %v3133_v59 = vpop.eup %3132 }
 0x4b9   :  { %v1184_v61 = vmul.f32 %v3133_v59, %v3131_v45 }
 0x4bb   :  { %1250 = vmatmul.mubr.f32.vlgmr.msra.gmra.mrb[8].mxu0 %v1184_v61  ;;  %1321 = vmatmul.mubr.f32.vlgmr.msra.gmra.mrb[8].mxu1 %v1184_v61 }
 0x4bc   :  { %2720 = vmatpush1.bf16.msra.mxu0 %v3556_v47  ;;  %2752 = vmatpush1.bf16.msra.mxu1 %v3559_v50 }
 0x4bd   :  { %2722 = vmatprep.subr.bf16.mxu0 %v3562_v53  ;;  %2754 = vmatprep.subr.bf16.mxu1 %v3564_v56 }
 0x4be   :  { %1419 = vmatprep.mubr.f32.mxu0 %v3398_v0  ;;  %1490 = vmatprep.mubr.f32.mxu1 %v3398_v0 }
 0x4c0   :  { %2724 = vmatpush1.bf16.msra.mxu0 %v3567_v60  ;;  %2756 = vmatpush1.bf16.msra.mxu1 %v3571_v63 }
 0x4c1   :  { %2726 = vmatprep.subr.bf16.mxu0 %v3575_v3  ;;  %2758 = vmatprep.subr.bf16.mxu1 %v3578_v6 }
 0x4c4   :  { %2728 = vmatpush1.bf16.msra.mxu0 %v3581_v10  ;;  %2760 = vmatpush1.bf16.msra.mxu1 %v3585_v13 }
 0x4c5   :  { %2730 = vmatprep.subr.bf16.mxu0 %v3589_v16  ;;  %2762 = vmatprep.subr.bf16.mxu1 %v3592_v19 }
 0x4c8   :  { %2732 = vmatpush1.bf16.msra.mxu0 %v3595_v23  ;;  %2764 = vmatpush1.bf16.msra.mxu1 %v3599_v26 }
 0x4c9   :  { %2734 = vmatprep.subr.bf16.mxu0 %v3603_v29  ;;  %2766 = vmatprep.subr.bf16.mxu1 %v3606_v32 }
 0x4cc   :  { %2736 = vmatpush1.bf16.msra.mxu0 %v3609_v36  ;;  %2768 = vmatpush1.bf16.msra.mxu1 %v3613_v40 }
 0x4cd   :  { %2738 = vmatprep.subr.bf16.mxu0 %v3617_v44  ;;  %2770 = vmatprep.subr.bf16.mxu1 %v3620_v48 }
 0x4d0   :  { %2740 = vmatpush1.bf16.msra.mxu0 %v3623_v54  ;;  %2772 = vmatpush1.bf16.msra.mxu1 %v3627_v58 }
 0x4d1   :  { %2742 = vmatprep.subr.bf16.mxu0 %v3631_v62  ;;  %2774 = vmatprep.subr.bf16.mxu1 %v3634_v4 }
 0x4d4   :  { %2744 = vmatpush1.bf16.msra.mxu0 %v3637_v9  ;;  %2776 = vmatpush1.bf16.msra.mxu1 %v3641_v14 }
 0x4d5   :  { %2746 = vmatprep.subr.bf16.mxu0 %v3645_v18  ;;  %2778 = vmatprep.subr.bf16.mxu1 %v3648_v22 }
 0x4d8   :  { %2748 = vmatpush1.bf16.msra.mxu0 %v3651_v25  ;;  %2780 = vmatpush1.bf16.msra.mxu1 %v3655_v27 }
 0x4d9   :  { %2782 = vmatprep.subr.bf16.mxu0 %v3552_v38  ;;  %2814 = vmatprep.subr.bf16.mxu1 %v3554_v41 }
 0x58e   :  { %v1251_v51 = vpop.f32.mrb[8].mxu0  ;;  %v1322_v2 = vpop.f32.mrb[8].mxu1 }
 0x58f   :  { %v2997_v5 = vadd.f32 %v1251_v51, %v3711_v35  ;;  %v1253_v7 = vpop.f32.mrb[9].mxu0  ;;  %v1324_v8 = vpop.f32.mrb[9].mxu1  ;;  %v3013_v21 = vadd.f32 %v1322_v2, %v3724_v1 }
 0x590   :  { %v2998_v11 = vadd.f32 %v1253_v7, %v3715_v37  ;;  %v3014_v17 = vadd.f32 %v1324_v8, %v3720_v57 }
 0x591   :  { %v2215_v12 = vmul.f32 -1.442695, %v2997_v5 }
 0x592   :  { %v2216_v15 = vmul.f32 -1.442695, %v2998_v11  ;;  %v2217_v20 = vmul.f32 -1.442695, %v3014_v17 }
 0x593   :  { %3134 = vpow2.f32 %v2215_v12 }
 0x594   :  { %3136 = vpow2.f32 %v2216_v15 }
 0x595   :  { %3138 = vpow2.f32 %v2217_v20 }
 0x596   :  { %3140 = vtanh.f32 %v3013_v21 }
 0x59d   :  { %v3135_v24 = vpop.eup %3134 }
 0x59e   :  { %v3137_v28 = vpop.eup %3136  ;;  %v1334_v39 = vadd.f32 1.0, %v3135_v24 }
 0x59f   :  { %v1340_v42 = vadd.f32 1.0, %v3137_v28  ;;  %v3139_v43 = vpop.eup %3138 }
 0x5a0   :  { %3142 = vrcp.f32 %v1334_v39  ;;  %v3141_v46 = vpop.eup %3140  ;;  %v1347_v45 = vadd.f32 1.0, %v3139_v43 }
 0x5a1   :  { %3144 = vrcp.f32 %v1340_v42 }
 0x5a2   :  { %3146 = vrcp.f32 %v1347_v45 }
 0x5aa   :  { %v3143_v49 = vpop.eup %3142 }
 0x5ab   :  { %v3145_v33 = vpop.eup %3144  ;;  %v1351_v52 = vmul.f32 %v3143_v49, %v3141_v46 }
 0x5ac   :  { %v1350_v59 = vmul.f32 %v3145_v33, %v3853_v55  ;;  %v3147_v51 = vpop.eup %3146 }
 0x5ae   :  { %v3895_v61 = vadd.f32 %v1351_v52, %v1350_v59 }
 0x5b0   :  { %3148 = vtanh.f32 %v3895_v61 }
 0x5ba   :  { %v3149_v2 = vpop.eup %3148 }
 0x5bb   :  { %v1354_v5 = vmul.f32 %v3149_v2, %v3147_v51 }
 0x5bd   :  { %1420 = vmatmul.mubr.f32.vlgmr.msra.gmra.mrb[10].mxu0 %v1354_v5  ;;  %1491 = vmatmul.mubr.f32.vlgmr.msra.gmra.mrb[10].mxu1 %v1354_v5 }
 0x5be   :  { %2784 = vmatpush1.bf16.msra.mxu0 %v3556_v47  ;;  %2816 = vmatpush1.bf16.msra.mxu1 %v3559_v50 }
 0x5bf   :  { %2786 = vmatprep.subr.bf16.mxu0 %v3562_v53  ;;  %2818 = vmatprep.subr.bf16.mxu1 %v3564_v56 }
 0x5c0   :  { %1589 = vmatprep.mubr.f32.mxu0 %v3398_v0  ;;  %1660 = vmatprep.mubr.f32.mxu1 %v3398_v0 }
 0x5c2   :  { %2788 = vmatpush1.bf16.msra.mxu0 %v3567_v60  ;;  %2820 = vmatpush1.bf16.msra.mxu1 %v3571_v63 }
 0x5c3   :  { %2790 = vmatprep.subr.bf16.mxu0 %v3575_v3  ;;  %2822 = vmatprep.subr.bf16.mxu1 %v3578_v6 }
 0x5c6   :  { %2792 = vmatpush1.bf16.msra.mxu0 %v3581_v10  ;;  %2824 = vmatpush1.bf16.msra.mxu1 %v3585_v13 }
 0x5c7   :  { %2794 = vmatprep.subr.bf16.mxu0 %v3589_v16  ;;  %2826 = vmatprep.subr.bf16.mxu1 %v3592_v19 }
 0x5ca   :  { %2796 = vmatpush1.bf16.msra.mxu0 %v3595_v23  ;;  %2828 = vmatpush1.bf16.msra.mxu1 %v3599_v26 }
 0x5cb   :  { %2798 = vmatprep.subr.bf16.mxu0 %v3603_v29  ;;  %2830 = vmatprep.subr.bf16.mxu1 %v3606_v32 }
 0x5ce   :  { %2800 = vmatpush1.bf16.msra.mxu0 %v3609_v36  ;;  %2832 = vmatpush1.bf16.msra.mxu1 %v3613_v40 }
 0x5cf   :  { %2802 = vmatprep.subr.bf16.mxu0 %v3617_v44  ;;  %2834 = vmatprep.subr.bf16.mxu1 %v3620_v48 }
 0x5d2   :  { %2804 = vmatpush1.bf16.msra.mxu0 %v3623_v54  ;;  %2836 = vmatpush1.bf16.msra.mxu1 %v3627_v58 }
 0x5d3   :  { %2806 = vmatprep.subr.bf16.mxu0 %v3631_v62  ;;  %2838 = vmatprep.subr.bf16.mxu1 %v3634_v4 }
 0x5d6   :  { %2808 = vmatpush1.bf16.msra.mxu0 %v3637_v9  ;;  %2840 = vmatpush1.bf16.msra.mxu1 %v3641_v14 }
 0x5d7   :  { %2810 = vmatprep.subr.bf16.mxu0 %v3645_v18  ;;  %2842 = vmatprep.subr.bf16.mxu1 %v3648_v22 }
 0x5da   :  { %2812 = vmatpush1.bf16.msra.mxu0 %v3651_v25  ;;  %2844 = vmatpush1.bf16.msra.mxu1 %v3655_v27 }
 0x5db   :  { %2846 = vmatprep.subr.bf16.mxu0 %v3552_v38  ;;  %2878 = vmatprep.subr.bf16.mxu1 %v3554_v41 }
 0x690   :  { %v1421_v55 = vpop.f32.mrb[10].mxu0  ;;  %v1492_v7 = vpop.f32.mrb[10].mxu1 }
 0x691   :  { %v2999_v8 = vadd.f32 %v1421_v55, %v3711_v35  ;;  %v1423_v11 = vpop.f32.mrb[11].mxu0  ;;  %v1494_v12 = vpop.f32.mrb[11].mxu1  ;;  %v3015_v28 = vadd.f32 %v1492_v7, %v3724_v1  ;;  %v1868_v7 = vld [vmem:[#allocation8 + $0x18] sm:$0xff] }
 0x692   :  { %v3000_v15 = vadd.f32 %v1423_v11, %v3715_v37  ;;  %v3016_v21 = vadd.f32 %v1494_v12, %v3720_v57  ;;  %v1869_v11 = vld [vmem:[#allocation8 + $0x20] sm:$0xff]  ;;  %v1870_v12 = vld [vmem:[#allocation8 + $0x28] sm:$0xff] }
 0x693   :  { %v2218_v17 = vmul.f32 -1.442695, %v2999_v8 }
 0x694   :  { %v2219_v20 = vmul.f32 -1.442695, %v3000_v15  ;;  %v2220_v24 = vmul.f32 -1.442695, %v3016_v21  ;;  %v2916_v15 = vpack.c.bf16 %v1870_v12, %v1869_v11 }
 0x695   :  { %3150 = vpow2.f32 %v2218_v17  ;;  %v1871_v17 = vld [vmem:[#allocation8 + $0x30] sm:$0xff] }
 0x696   :  { %3152 = vpow2.f32 %v2219_v20  ;;  %v1872_v20 = vld [vmem:[#allocation8 + $0x38] sm:$0xff] }
 0x697   :  { %3154 = vpow2.f32 %v2220_v24  ;;  %v2919_v21 = vpack.c.bf16 %v1872_v20, %v1871_v17  ;;  %v1873_v24 = vld [vmem:[#allocation8 + $0x40] sm:$0xff] }
 0x698   :  { %3156 = vtanh.f32 %v3015_v28  ;;  %v1874_v28 = vld [vmem:[#allocation8 + $0x48] sm:$0xff] }
 0x69f   :  { %v3151_v38 = vpop.eup %3150 }
 0x6a0   :  { %v3153_v39 = vpop.eup %3152  ;;  %v1504_v41 = vadd.f32 1.0, %v3151_v38  ;;  %v2922_v38 = vpack.c.bf16 %v1874_v28, %v1873_v24  ;;  %v1973_v24 = vld [vmem:[#allocation10 + $0x70] sm:$0xff]  ;;  %v1974_v28 = vld [vmem:[#allocation10 + $0x78] sm:$0xff] }
 0x6a1   :  { %v1510_v42 = vadd.f32 1.0, %v3153_v39  ;;  %v3155_v43 = vpop.eup %3154  ;;  %v1875_v39 = vld [vmem:[#allocation8 + $0x50] sm:$0xff] }
 0x6a2   :  { %3158 = vrcp.f32 %v1504_v41  ;;  %v3157_v46 = vpop.eup %3156  ;;  %v1517_v45 = vadd.f32 1.0, %v3155_v43  ;;  %v1876_v41 = vld [vmem:[#allocation8 + $0x58] sm:$0xff] }
 0x6a3   :  { %3160 = vrcp.f32 %v1510_v42  ;;  %v1877_v42 = vld [vmem:[#allocation8 + $0x60] sm:$0xff]  ;;  %v2925_v43 = vpack.c.bf16 %v1876_v41, %v1875_v39  ;;  %v2055_v39 = vld [vmem:[#allocation11 + $0x8] sm:$0xff]  ;;  %v2057_v41 = vld [vmem:[#allocation11 + $0x18] sm:$0xff] }
 0x6a4   :  { %3162 = vrcp.f32 %v1517_v45 }
 0x6ac   :  { %v3159_v49 = vpop.eup %3158 }
 0x6ad   :  { %v3161_v33 = vpop.eup %3160  ;;  %v1521_v52 = vmul.f32 %v3159_v49, %v3157_v46  ;;  %v1878_v46 = vld [vmem:[#allocation8 + $0x68] sm:$0xff] }
 0x6ae   :  { %v1520_v59 = vmul.f32 %v3161_v33, %v3895_v61  ;;  %v3163_v2 = vpop.eup %3162  ;;  %v1867_v61 = vld [vmem:[#allocation8 + $0x10] sm:$0xff]  ;;  %v2928_v49 = vpack.c.bf16 %v1878_v46, %v1877_v42  ;;  %v2054_v42 = vld [vmem:[#allocation11] sm:$0xff] }
 0x6af   :  { %v2913_v8 = vpack.c.bf16 %v1868_v7, %v1867_v61  ;;  %v1879_v33 = vld [vmem:[#allocation8 + $0x70] sm:$0xff] }
 0x6b0   :  { %v3937_v51 = vadd.f32 %v1521_v52, %v1520_v59  ;;  %v1880_v52 = vld [vmem:[#allocation8 + $0x78] sm:$0xff]  ;;  %v1959_v59 = vld [vmem:[#allocation10] sm:$0xff]  ;;  %v2056_v46 = vld [vmem:[#allocation11 + $0x10] sm:$0xff] }
 0x6b1   :  { %v2931_v45 = vpack.c.bf16 %v1880_v52, %v1879_v33  ;;  %v2959_v33 = vpack.c.bf16 %v2056_v46, %v2054_v42 }
 0x6b2   :  { %3164 = vtanh.f32 %v3937_v51 }
 0x6bc   :  { %v3165_v5 = vpop.eup %3164 }
 0x6bd   :  { %v1524_v55 = vmul.f32 %v3165_v5, %v3163_v2  ;;  %v1961_v2 = vld [vmem:[#allocation10 + $0x10] sm:$0xff] }
 0x6bf   :  { %1590 = vmatmul.mubr.f32.vlgmr.msra.gmra.mrb[12].mxu0 %v1524_v55  ;;  %1661 = vmatmul.mubr.f32.vlgmr.msra.gmra.mrb[12].mxu1 %v1524_v55  ;;  %v1962_v55 = vld [vmem:[#allocation10 + $0x18] sm:$0xff] }
 0x6c0   :  { %2848 = vmatpush1.bf16.msra.mxu0 %v3556_v47  ;;  %2880 = vmatpush1.bf16.msra.mxu1 %v3559_v50 }
 0x6c1   :  { %2850 = vmatprep.subr.bf16.mxu0 %v3562_v53  ;;  %2882 = vmatprep.subr.bf16.mxu1 %v3564_v56 }
 0x6c2   :  { %1759 = vmatprep.mubr.f32.mxu0 %v3398_v0  ;;  %1830 = vmatprep.mubr.f32.mxu1 %v3398_v0 }
 0x6c4   :  { %2852 = vmatpush1.bf16.msra.mxu0 %v3567_v60  ;;  %2884 = vmatpush1.bf16.msra.mxu1 %v3571_v63 }
 0x6c5   :  { %2854 = vmatprep.subr.bf16.mxu0 %v3575_v3  ;;  %2886 = vmatprep.subr.bf16.mxu1 %v3578_v6 }
 0x6c8   :  { %2856 = vmatpush1.bf16.msra.mxu0 %v3581_v10  ;;  %2888 = vmatpush1.bf16.msra.mxu1 %v3585_v13 }
 0x6c9   :  { %2858 = vmatprep.subr.bf16.mxu0 %v3589_v16  ;;  %2890 = vmatprep.subr.bf16.mxu1 %v3592_v19 }
 0x6cc   :  { %2860 = vmatpush1.bf16.msra.mxu0 %v3595_v23  ;;  %2892 = vmatpush1.bf16.msra.mxu1 %v3599_v26 }
 0x6cd   :  { %2862 = vmatprep.subr.bf16.mxu0 %v3603_v29  ;;  %2894 = vmatprep.subr.bf16.mxu1 %v3606_v32 }
 0x6d0   :  { %2864 = vmatpush1.bf16.msra.mxu0 %v3609_v36  ;;  %2896 = vmatpush1.bf16.msra.mxu1 %v3613_v40 }
 0x6d1   :  { %2866 = vmatprep.subr.bf16.mxu0 %v3617_v44  ;;  %2898 = vmatprep.subr.bf16.mxu1 %v3620_v48 }
 0x6d4   :  { %2868 = vmatpush1.bf16.msra.mxu0 %v3623_v54  ;;  %2900 = vmatpush1.bf16.msra.mxu1 %v3627_v58 }
 0x6d5   :  { %2870 = vmatprep.subr.bf16.mxu0 %v3631_v62  ;;  %2902 = vmatprep.subr.bf16.mxu1 %v3634_v4 }
 0x6d8   :  { %2872 = vmatpush1.bf16.msra.mxu0 %v3637_v9  ;;  %2904 = vmatpush1.bf16.msra.mxu1 %v3641_v14 }
 0x6d9   :  { %2874 = vmatprep.subr.bf16.mxu0 %v3645_v18  ;;  %2906 = vmatprep.subr.bf16.mxu1 %v3648_v22  ;;  %v1865_v18 = vld [vmem:[#allocation8] sm:$0xff]  ;;  %v1866_v22 = vld [vmem:[#allocation8 + $0x8] sm:$0xff] }
 0x6dc   :  { %2876 = vmatpush1.bf16.msra.mxu0 %v3651_v25  ;;  %2908 = vmatpush1.bf16.msra.mxu1 %v3655_v27  ;;  %v2910_v25 = vpack.c.bf16 %v1866_v22, %v1865_v18  ;;  %v3399_v27 = vmov 0.0|0.0  }
 0x6dd   :  { %2909 = vmatprep.subr.bf16.mxu0 %v3399_v27  ;;  %2933 = vmatprep.subr.bf16.mxu1 %v3399_v27 }
 0x792   :  { %v1591_v47 = vpop.f32.mrb[12].mxu0  ;;  %v1662_v50 = vpop.f32.mrb[12].mxu1 }
 0x793   :  { %v3001_v53 = vadd.f32 %v1591_v47, %v3711_v35  ;;  %v1593_v56 = vpop.f32.mrb[13].mxu0  ;;  %v1664_v60 = vpop.f32.mrb[13].mxu1  ;;  %v3017_v16 = vadd.f32 %v1662_v50, %v3724_v1  ;;  %v2937_v47 = vpack.c.bf16 %v1962_v55, %v1961_v2  ;;  %v1963_v50 = vld [vmem:[#allocation10 + $0x20] sm:$0xff]  ;;  %v2065_v2 = vld [vmem:[#allocation11 + $0x58] sm:$0xff] }
 0x794   :  { %v3002_v63 = vadd.f32 %v1593_v56, %v3715_v37  ;;  %v3018_v10 = vadd.f32 %v1664_v60, %v3720_v57  ;;  %v1965_v60 = vld [vmem:[#allocation10 + $0x30] sm:$0xff]  ;;  %v2062_v55 = vld [vmem:[#allocation11 + $0x40] sm:$0xff] }
 0x795   :  { %v2221_v3 = vmul.f32 -1.442695, %v3001_v53  ;;  %v1964_v53 = vld [vmem:[#allocation10 + $0x28] sm:$0xff] }
 0x796   :  { %v2222_v6 = vmul.f32 -1.442695, %v3002_v63  ;;  %v2223_v13 = vmul.f32 -1.442695, %v3018_v10  ;;  %v2940_v56 = vpack.c.bf16 %v1964_v53, %v1963_v50  ;;  %v1966_v63 = vld [vmem:[#allocation10 + $0x38] sm:$0xff]  ;;  %v1968_v10 = vld [vmem:[#allocation10 + $0x48] sm:$0xff] }
 0x797   :  { %3166 = vpow2.f32 %v2221_v3  ;;  %v2943_v3 = vpack.c.bf16 %v1966_v63, %v1965_v60  ;;  %v2067_v50 = vld [vmem:[#allocation11 + $0x68] sm:$0xff]  ;;  %v2069_v53 = vld [vmem:[#allocation11 + $0x78] sm:$0xff]  ;;  %v2066_v63 = vld [vmem:[#allocation11 + $0x60] sm:$0xff] }
 0x798   :  { %3168 = vpow2.f32 %v2222_v6  ;;  %v1967_v6 = vld [vmem:[#allocation10 + $0x40] sm:$0xff]  ;;  %v2969_v60 = vpack.c.bf16 %v2069_v53, %v2067_v50 }
 0x799   :  { %3170 = vpow2.f32 %v2223_v13  ;;  %v2946_v13 = vpack.c.bf16 %v1968_v10, %v1967_v6  ;;  %v2071_v6 = vld [vmem:[#allocation11 + $0x88] sm:$0xff]  ;;  %v2073_v10 = vld [vmem:[#allocation11 + $0x98] sm:$0xff] }
 0x79a   :  { %3172 = vtanh.f32 %v3017_v16  ;;  %v1969_v16 = vld [vmem:[#allocation10 + $0x50] sm:$0xff] }
 0x7a1   :  { %v3167_v19 = vpop.eup %3166 }
 0x7a2   :  { %v3169_v23 = vpop.eup %3168  ;;  %v1674_v26 = vadd.f32 1.0, %v3167_v19  ;;  %v1970_v19 = vld [vmem:[#allocation10 + $0x58] sm:$0xff] }
 0x7a3   :  { %v1680_v29 = vadd.f32 1.0, %v3169_v23  ;;  %v3171_v32 = vpop.eup %3170  ;;  %v2949_v23 = vpack.c.bf16 %v1970_v19, %v1969_v16  ;;  %v2973_v16 = vpack.c.bf16 %v2073_v10, %v2071_v6  ;;  %v2070_v19 = vld [vmem:[#allocation11 + $0x80] sm:$0xff] }
 0x7a4   :  { %3174 = vrcp.f32 %v1674_v26  ;;  %v3173_v36 = vpop.eup %3172  ;;  %v1687_v54 = vadd.f32 1.0, %v3171_v32  ;;  %v1971_v26 = vld [vmem:[#allocation10 + $0x60] sm:$0xff] }
 0x7a5   :  { %3176 = vrcp.f32 %v1680_v29  ;;  %v1972_v29 = vld [vmem:[#allocation10 + $0x68] sm:$0xff] }
 0x7a6   :  { %3178 = vrcp.f32 %v1687_v54  ;;  %v2952_v32 = vpack.c.bf16 %v1972_v29, %v1971_v26  ;;  %v2075_v26 = vld [vmem:[#allocation11 + $0xa8] sm:$0xff]  ;;  %v2077_v29 = vld [vmem:[#allocation11 + $0xb8] sm:$0xff] }
 0x7ae   :  { %v3175_v40 = vpop.eup %3174 }
 0x7af   :  { %v3177_v44 = vpop.eup %3176  ;;  %v1691_v48 = vmul.f32 %v3175_v40, %v3173_v36 }
 0x7b0   :  { %v1690_v58 = vmul.f32 %v3177_v44, %v3937_v51  ;;  %v3179_v4 = vpop.eup %3178  ;;  %v1960_v51 = vld [vmem:[#allocation10 + $0x8] sm:$0xff] }
 0x7b1   :  { %v2934_v5 = vpack.c.bf16 %v1960_v51, %v1959_v59  ;;  %v2060_v59 = vld [vmem:[#allocation11 + $0x30] sm:$0xff]  ;;  %v2063_v51 = vld [vmem:[#allocation11 + $0x48] sm:$0xff] }
 0x7b2   :  { %v3977_v62 = vadd.f32 %v1691_v48, %v1690_v58 }
 0x7b4   :  { %3180 = vtanh.f32 %v3977_v62 }
 0x7be   :  { %v3181_v9 = vpop.eup %3180 }
 0x7bf   :  { %v1694_v14 = vmul.f32 %v3181_v9, %v3179_v4 }
 0x7c1   :  { %1760 = vmatmul.mubr.f32.vlgmr.msra.gmra.mrb[14].mxu0 %v1694_v14  ;;  %1831 = vmatmul.mubr.f32.vlgmr.msra.gmra.mrb[14].mxu1 %v1694_v14 }
 0x7c2   :  { %2911 = vmatpush3.bf16.msra.mxu0 %v2910_v25  ;;  %2295 = vmatprep.mubr.msk.f32.mxu0 %vm3400_vm0, %v3398_v0 }
 0x7c3   :  { %2912 = vmatprep.subr.bf16.mxu0 %v3399_v27  ;;  %2330 = vmatprep.mubr.msk.f32.mxu1 %vm3400_vm0, %v3398_v0 }
 0x7c4   :  { %2935 = vmatpush3.bf16.msra.mxu1 %v2934_v5  ;;  %v2965_v5 = vpack.c.bf16 %v2065_v2, %v2063_v51 }
 0x7c5   :  { %2936 = vmatprep.subr.bf16.mxu1 %v3399_v27 }
 0x7c6   :  { %2914 = vmatpush3.bf16.msra.mxu0 %v2913_v8 }
 0x7c7   :  { %2915 = vmatprep.subr.bf16.mxu0 %v3399_v27 }
 0x7c8   :  { %2938 = vmatpush3.bf16.msra.mxu1 %v2937_v47  ;;  %v2064_v47 = vld [vmem:[#allocation11 + $0x50] sm:$0xff] }
 0x7c9   :  { %2939 = vmatprep.subr.bf16.mxu1 %v3399_v27 }
 0x7ca   :  { %2917 = vmatpush3.bf16.msra.mxu0 %v2916_v15 }
 0x7cb   :  { %2918 = vmatprep.subr.bf16.mxu0 %v3399_v27 }
 0x7cc   :  { %2941 = vmatpush3.bf16.msra.mxu1 %v2940_v56  ;;  %v2967_v56 = vpack.c.bf16 %v2064_v47, %v2062_v55 }
 0x7cd   :  { %2942 = vmatprep.subr.bf16.mxu1 %v3399_v27 }
 0x7ce   :  { %2920 = vmatpush3.bf16.msra.mxu0 %v2919_v21 }
 0x7cf   :  { %2921 = vmatprep.subr.bf16.mxu0 %v3399_v27 }
 0x7d0   :  { %2944 = vmatpush3.bf16.msra.mxu1 %v2943_v3  ;;  %v2068_v3 = vld [vmem:[#allocation11 + $0x70] sm:$0xff] }
 0x7d1   :  { %2945 = vmatprep.subr.bf16.mxu1 %v3399_v27 }
 0x7d2   :  { %2923 = vmatpush3.bf16.msra.mxu0 %v2922_v38  ;;  %v2955_v38 = vpack.c.bf16 %v1974_v28, %v1973_v24 }
 0x7d3   :  { %2924 = vmatprep.subr.bf16.mxu0 %v3399_v27 }
 0x7d4   :  { %2947 = vmatpush3.bf16.msra.mxu1 %v2946_v13  ;;  %v2971_v13 = vpack.c.bf16 %v2068_v3, %v2066_v63 }
 0x7d5   :  { %2948 = vmatprep.subr.bf16.mxu1 %v3399_v27 }
 0x7d6   :  { %2926 = vmatpush3.bf16.msra.mxu0 %v2925_v43  ;;  %v2957_v43 = vpack.c.bf16 %v2057_v41, %v2055_v39 }
 0x7d7   :  { %2927 = vmatprep.subr.bf16.mxu0 %v3399_v27 }
 0x7d8   :  { %2950 = vmatpush3.bf16.msra.mxu1 %v2949_v23  ;;  %v2072_v23 = vld [vmem:[#allocation11 + $0x90] sm:$0xff] }
 0x7d9   :  { %2951 = vmatprep.subr.bf16.mxu1 %v3399_v27 }
 0x7da   :  { %2929 = vmatpush3.bf16.msra.mxu0 %v2928_v49  ;;  %v2059_v49 = vld [vmem:[#allocation11 + $0x28] sm:$0xff] }
 0x7db   :  { %2930 = vmatprep.subr.bf16.mxu0 %v3399_v27 }
 0x7dc   :  { %2953 = vmatpush3.bf16.msra.mxu1 %v2952_v32  ;;  %v2975_v32 = vpack.c.bf16 %v2072_v23, %v2070_v19 }
 0x7dd   :  { %2954 = vmatprep.subr.bf16.mxu1 %v3399_v27 }
 0x7de   :  { %2932 = vmatpush3.bf16.msra.mxu0 %v2931_v45  ;;  %v2058_v45 = vld [vmem:[#allocation11 + $0x20] sm:$0xff] }
 0x7df   :  { %2958 = vmatprep.subr.bf16.mxu0 %v2957_v43 }
 0x7e0   :  { %2956 = vmatpush3.bf16.msra.mxu1 %v2955_v38 }
 0x894   :  { %v1761_v36 = vpop.f32.mrb[14].mxu0  ;;  %v1832_v40 = vpop.f32.mrb[14].mxu1 }
 0x895   :  { %v3003_v44 = vadd.f32 %v1761_v36, %v3711_v35  ;;  %v1763_v48 = vpop.f32.mrb[15].mxu0  ;;  %v1834_v54 = vpop.f32.mrb[15].mxu1  ;;  %v3019_v22 = vadd.f32 %v1832_v40, %v3724_v1  ;;  %v2977_v36 = vpack.c.bf16 %v2077_v29, %v2075_v26  ;;  %v2074_v40 = vld [vmem:[#allocation11 + $0xa0] sm:$0xff] }
 0x896   :  { %v3004_v58 = vadd.f32 %v1763_v48, %v3715_v37  ;;  %v3020_v14 = vadd.f32 %v1834_v54, %v3720_v57  ;;  %v2079_v48 = vld [vmem:[#allocation11 + $0xc8] sm:$0xff]  ;;  %v2081_v54 = vld [vmem:[#allocation11 + $0xd8] sm:$0xff] }
 0x897   :  { %v2224_v4 = vmul.f32 -1.442695, %v3003_v44  ;;  %v2076_v44 = vld [vmem:[#allocation11 + $0xb0] sm:$0xff] }
 0x898   :  { %v2225_v9 = vmul.f32 -1.442695, %v3004_v58  ;;  %v2226_v18 = vmul.f32 -1.442695, %v3020_v14  ;;  %v2979_v58 = vpack.c.bf16 %v2076_v44, %v2074_v40  ;;  %v2080_v14 = vld [vmem:[#allocation11 + $0xd0] sm:$0xff] }
 0x899   :  { %3182 = vpow2.f32 %v2224_v4  ;;  %v2981_v4 = vpack.c.bf16 %v2081_v54, %v2079_v48 }
 0x89a   :  { %3184 = vpow2.f32 %v2225_v9  ;;  %v2078_v9 = vld [vmem:[#allocation11 + $0xc0] sm:$0xff] }
 0x89b   :  { %3186 = vpow2.f32 %v2226_v18  ;;  %v2983_v18 = vpack.c.bf16 %v2080_v14, %v2078_v9 }
 0x89c   :  { %3188 = vtanh.f32 %v3019_v22  ;;  %v2227_v22 = vld [vmem:[%s4046_s5] ss:$0 sm:$0xff]  ;;  %s3401_s5 = smov [#allocation14]  }
 0x89d   :  { %s2187_s21 = sshll.u32 %s3401_s5, 4  ;;  %s2188_s21 = int_to_ptr.vmem [resolvable:$true] %s2187_s21 }
 0x89e   :  { %s3330_s23 = scalar_lea.vmem %s2188_s21, 128  ;;  %p3335_p7 = scmp.lt.s32.totalorder %s2188_s21, %s2188_s21 }
 0x89f   :  { %p3331_p6 = scmp.ne.s32.totalorder %s2188_s21, %s3330_s23  ;;  %p3336_p8 = scmp.lt.s32.totalorder %s3330_s23, %s3330_s23 }
 0x8a1   :  { %p3337_p9 = por %p3336_p8, %p3335_p7 }
 0x8a3   :  { %v3183_v25 = vpop.eup %3182  ;;  %p3338_p10 = pnand %p3337_p9, %p3331_p6 }
 0x8a4   :  { %v3185_v61 = vpop.eup %3184  ;;  %v1844_v27 = vadd.f32 1.0, %v3183_v25 }
 0x8a5   :  { %v1850_v7 = vadd.f32 1.0, %v3185_v61  ;;  %v3187_v35 = vpop.eup %3186 }
 0x8a6   :  { %3190 = vrcp.f32 %v1844_v27  ;;  %v3189_v8 = vpop.eup %3188  ;;  %v1857_v15 = vadd.f32 1.0, %v3187_v35  ;;  %v2083_v35 = vld [vmem:[#allocation11 + $0xe8] sm:$0xff] }
 0x8a7   :  { %3192 = vrcp.f32 %v1850_v7 }
 0x8a8   :  { %3194 = vrcp.f32 %v1857_v15 }
 0x8b0   :  { %v3191_v37 = vpop.eup %3190 }
 0x8b1   :  { %v3193_v11 = vpop.eup %3192  ;;  %v1861_v12 = vmul.f32 %v3191_v37, %v3189_v8  ;;  %v2085_v8 = vld [vmem:[#allocation11 + $0xf8] sm:$0xff] }
 0x8b2   :  { %v1860_v17 = vmul.f32 %v3193_v11, %v3977_v62  ;;  %v3195_v1 = vpop.eup %3194  ;;  %v2061_v62 = vld [vmem:[#allocation11 + $0x38] sm:$0xff]  ;;  %v2985_v37 = vpack.c.bf16 %v2085_v8, %v2083_v35  ;;  %v2082_v11 = vld [vmem:[#allocation11 + $0xe0] sm:$0xff] }
 0x8b3   :  { %v2961_v52 = vpack.c.bf16 %v2061_v62, %v2059_v49 }
 0x8b4   :  { %v1862_v57 = vadd.f32 %v1861_v12, %v1860_v17  ;;  %v2084_v12 = vld [vmem:[#allocation11 + $0xf0] sm:$0xff]  ;;  %v2228_v17 = vld [vmem:[%s4048_s7] ss:$0 sm:$0xff] }
 0x8b5   :  { %v2987_v15 = vpack.c.bf16 %v2084_v12, %v2082_v11 }
 0x8b6   :  { %3196 = vtanh.f32 %v1862_v57 }
 0x8c0   :  { %v3197_v20 = vpop.eup %3196 }
 0x8c1   :  { %v1864_v21 = vmul.f32 %v3197_v20, %v3195_v1 }
 0x8c3   :  { %2296 = vmatmul.mubr.f32.vlgmr.msra.gmra.mrb[16].mxu0 %v1864_v21 }
 0x8c4   :  { %2162 = vmatprep.mubr.f32.mxu0 %v3398_v0  ;;  %2960 = vmatpush1.bf16.msra.mxu0 %v2959_v33  ;;  %v2963_v0 = vpack.c.bf16 %v2060_v59, %v2058_v45 }
 0x8c5   :  { %2962 = vmatprep.subr.bf16.mxu0 %v2961_v52 }
 0x8c8   :  { %2964 = vmatpush1.bf16.msra.mxu0 %v2963_v0 }
 0x8c9   :  { %2966 = vmatprep.subr.bf16.mxu0 %v2965_v5 }
 0x8cc   :  { %2968 = vmatpush1.bf16.msra.mxu0 %v2967_v56 }
 0x8cd   :  { %2970 = vmatprep.subr.bf16.mxu0 %v2969_v60 }
 0x8d0   :  { %2972 = vmatpush1.bf16.msra.mxu0 %v2971_v13 }
 0x8d1   :  { %2974 = vmatprep.subr.bf16.mxu0 %v2973_v16 }
 0x8d4   :  { %2976 = vmatpush1.bf16.msra.mxu0 %v2975_v32 }
 0x8d5   :  { %2978 = vmatprep.subr.bf16.mxu0 %v2977_v36 }
 0x8d8   :  { %2980 = vmatpush1.bf16.msra.mxu0 %v2979_v58 }
 0x8d9   :  { %2982 = vmatprep.subr.bf16.mxu0 %v2981_v4 }
 0x8dc   :  { %2984 = vmatpush1.bf16.msra.mxu0 %v2983_v18 }
 0x8dd   :  { %2986 = vmatprep.subr.bf16.mxu0 %v2985_v37 }
 0x8e0   :  { %2988 = vmatpush1.bf16.msra.mxu0 %v2987_v15 }
 0x996   :  { %v1954_v25 = vpop.f32.mrb[16].mxu0 }
 0x997   :  { %v1955_v61 = vadd.f32 %v2227_v22, %v1954_v25  ;;  %v2297_v27 = vpop.f32.mrb[17].mxu0 }
 0x999   :  { %v1958_v7 = vmax.f32 %v1955_v61, 0.0 }
 0x99b   :  { %2331 = vmatmul.mubr.f32.vlgmr.msra.gmra.mrb[16].mxu1 %v1958_v7 }
 0xa6e   :  { %v2048_v57 = vpop.f32.mrb[16].mxu1 }
 0xa6f   :  { %v2049_v1 = vadd.f32 %v2228_v17, %v2048_v57  ;;  %v2332_v20 = vpop.f32.mrb[17].mxu1 }
 0xa71   :  { %v2053_v21 = vmax.f32 %v2049_v1, 0.0  ;;  %2052 = vst [vmem:[#allocation14] sm:$0xff] %v2049_v1 }
 0xa73   :  { %2163 = vmatmul.mubr.f32.vlgmr.msra.gmra.mrb[18].mxu0 %v2053_v21 }
 0xa74   :  { %3341 = shalt.err (!%p3338_p10)
}
 0xa75   :  { %s3342_s7 = scalar_lea.hbm %s4052_s11, 128 }
 0xa76   :  { %p3343_p11 = scmp.ne.s32.totalorder %s4052_s11, %s3342_s7  ;;  %p3346_p12 = scmp.lt.u32.totalorder %s3342_s7, %s4052_s11 }
 0xa78   :  { %p3348_p13 = pnand %p3346_p12, %p3343_p11 }
 0xa7a   :  { %3351 = shalt.err (!%p3348_p13)
}
 0xa7b   :  { %2190 = dma.vmem_to_hbm [thread:$0]  %s2188_s21, 128, %s4052_s11, [#allocation15]   ;;  %v2086_v24 = vld [vmem:[%s4050_s9] sm:$0x3] }
 0xa7c   :  { %v2091_v28 = vrot.slane %v2086_v24, %v197_v31  ;;  %v2095_v38 = vrot.slane %v2086_v24, %v201_v34  ;;  %s3402_s16 = smov [#allocation13]  }
 0xa7d   :  { %s2177_s0 = sshll.u32 %s3402_s16, 4  ;;  %s2178_s0 = int_to_ptr.vmem [resolvable:$true] %s2177_s0 }
 0xa7e   :  { %s3352_s11 = scalar_lea.vmem %s2178_s0, 256  ;;  %p3357_p1 = scmp.lt.s32.totalorder %s2178_s0, %s2178_s0 }
 0xa7f   :  { %p3353_p0 = scmp.ne.s32.totalorder %s2178_s0, %s3352_s11  ;;  %p3358_p2 = scmp.lt.s32.totalorder %s3352_s11, %s3352_s11 }
 0xa81   :  { %p3359_p3 = por %p3358_p2, %p3357_p1 }
 0xa83   :  { %p3360_p4 = pnand %p3359_p3, %p3353_p0 }
 0xb46   :  { %v2164_v39 = vpop.f32.mrb[18].mxu0 }
 0xb47   :  { %v2165_v41 = vadd.f32 %v2164_v39, %v2091_v28  ;;  %v2166_v42 = vpop.f32.mrb[19].mxu0 }
 0xb48   :  { %v2167_v43 = vadd.f32 %v2166_v42, %v2095_v38 }
 0xb49   :  { %2169 = vst [vmem:[#allocation13] sm:$0xff] %v2165_v41 }
 0xb4a   :  { %2170 = vst [vmem:[#allocation13 + $0x8] sm:$0xff] %v2167_v43 }
 0xb4b   :  { %3363 = shalt.err (!%p3360_p4)
}
 0xb4c   :  { %s3364_s17 = scalar_lea.hbm %s4051_s10, 256 }
 0xb4d   :  { %p3365_p5 = scmp.ne.s32.totalorder %s4051_s10, %s3364_s17  ;;  %p3368_p6 = scmp.lt.u32.totalorder %s3364_s17, %s4051_s10 }
 0xb4f   :  { %p3370_p7 = pnand %p3368_p6, %p3365_p5 }
 0xb51   :  { %3373 = shalt.err (!%p3370_p7)
}
 0xb52   :  { %2180 = dma.vmem_to_hbm [thread:$0]  %s2178_s0, 256, %s4051_s10, [#allocation4]  }
 0xb53   :  { %3382 = dma.done.wait [#allocation4], 256  }
 0xb54   :  { %3383 = vsyncadd [#allocation4], 4294967040 }
 0xb55   :  { %3384 = dma.done.wait [#allocation15], 128  }
 0xb56   :  { %3385 = vsyncadd [#allocation15], 4294967168 }
 0xb57   :  { %2197 = vsyncpa [#allocation3], 1 }
 0xb58   :  { %2198 = vsyncpa [#allocation6], 1 }
 0xb59   :  { %2199 = vsyncpa [#allocation9], 1 }
 0xb5a   :  { %2200 = vsyncpa [#allocation12], 1 }
 0xb5b   :  { %2201 = vsyncpa [#allocation4], 1 }
 0xb5c   :  { %2202 = vsyncpa [#allocation15], 1 }

</bundles_post_ra>
